<compile_context>
chip_gen: v7x
topology: tpu7x:2x2x1
jax: 0.10.0
libtpu: 0.0.40
codegen_flags: <defaults>
</compile_context>

<pallas_src>
import math
import functools

import jax
import jax.numpy as jnp
from jax.experimental import pallas as pl
from jax.experimental.pallas import tpu as pltpu


# ---- bias-pack row indices (one (1, W) row per bias / LN param) -------------
B_CLS1, B_CLS2 = 0, 1
B_IND1, B_K1, B_Q1 = 2, 3, 4
B_IND2, B_IND = 5, 6
B_K2, B_K3 = 7, 8
B_Q2, B_Q3 = 9, 10
B_LNG, B_LNB = 11, 12
B_TY1, B_TR1 = 13, 14
B_TY2, B_TY = 15, 16
B_TR2 = 17
NUM_BIAS_ROWS = 18


def role_model_kernel(
    # inputs -------------------------------------------------------------
    x_ref,                                   # pooler_output features (B, H) f32
    cls1_w, cls2_w,                          # (H, H) bf16
    fused1_w,                                # (H, 3H) bf16 = [ind1 | k1 | q1]
    ind2_w, ind_w,                           # (H, H), (H, R_PAD) bf16
    k2_w, k3_w, q2_w, q3_w,                  # (H, H) bf16
    fused2_w,                                # (H, 2H) bf16 = [ty1 | tr1]
    ty2_w, ty_w, tr2_w,                      # (H, H), (H, R_PAD), (H, H) bf16
    bias_ref,                                # (NUM_BIAS_ROWS, W) f32 packed biases
    # outputs ------------------------------------------------------------
    clust_out, keys_out, query_out, s_out, textx_out,
    trigger_out, indiv_out, type_out,
    *, inv_sqrt_f, hidden, r_pad,
):
    f32 = jnp.float32
    bf16 = jnp.bfloat16
    H = hidden

    def brow(i, width=H):
        # static (1, width) slice out of the packed bias slab
        return bias_ref[i:i + 1, :width]

    def lin(x, w_ref, bias_idx, width=H):
        # bf16 MXU operands, f32 accumulation; bias add in f32
        y = jnp.dot(x.astype(bf16), w_ref[...], preferred_element_type=f32)
        return y + brow(bias_idx, width)

    def layernorm(x, g, b, eps=1e-5):
        mu = jnp.mean(x, axis=-1, keepdims=True)
        d = x - mu
        var = jnp.mean(d * d, axis=-1, keepdims=True)
        return d * jax.lax.rsqrt(var + eps) * g + b

    relu = lambda v: jnp.maximum(v, 0.0)

    x0 = x_ref[...].astype(f32)

    # ---- cls head: text_x = cls2(relu(cls1(pooler))) ----
    text_x = lin(relu(lin(x0, cls1_w, B_CLS1)), cls2_w, B_CLS2)
    textx_out[...] = text_x
    tx_bf = text_x.astype(bf16)

    # ---- fused first layers of the three text_x heads: [ind1 | k1 | q1] ----
    fused1 = jnp.dot(tx_bf, fused1_w[...], preferred_element_type=f32)
    ind_h = relu(fused1[:, 0:H] + brow(B_IND1))
    key_h = relu(fused1[:, H:2 * H] + brow(B_K1))
    qry_h = relu(fused1[:, 2 * H:3 * H] + brow(B_Q1))

    # ---- individual role head (R logits live in the first R lanes) ----
    indiv = relu(lin(ind_h, ind2_w, B_IND2))
    indiv = lin(indiv, ind_w, B_IND, width=r_pad)
    indiv_out[...] = indiv

    # ---- Clusterer (dropout == identity, eval mode); reference uses self.ln
    #      for BOTH the keys and query branches ----
    g = brow(B_LNG)
    b = brow(B_LNB)

    keys = relu(lin(key_h, k2_w, B_K2))
    keys = layernorm(keys, g, b)
    keys = lin(keys, k3_w, B_K3)
    keys_out[...] = keys

    query = relu(lin(qry_h, q2_w, B_Q2))
    query = layernorm(query, g, b)
    query = lin(query, q3_w, B_Q3)
    query_out[...] = query

    # S = query @ keys.T / sqrt(H): contract last axes directly so no keys.T
    # relayout is materialized.  The 1/sqrt(H) scale is NOT folded into q3_w
    # because `query` itself is a returned output and must stay unscaled.
    s = jax.lax.dot_general(
        query.astype(bf16), keys.astype(bf16),
        dimension_numbers=(((1,), (1,)), ((), ())),
        preferred_element_type=f32) * inv_sqrt_f
    s_out[...] = s

    # softmax over the keys axis (axis=1), f32, denominator via EUP reciprocal
    s_max = jnp.max(s, axis=1, keepdims=True)
    e = jnp.exp(s - s_max)
    sims = e * pl.reciprocal(jnp.sum(e, axis=1, keepdims=True), approx=True)

    clust_x = jnp.dot(sims.astype(bf16), tx_bf, preferred_element_type=f32)
    clust_out[...] = clust_x
    cx_bf = clust_x.astype(bf16)

    # ---- fused first layers of the two clust_x heads: [ty1 | tr1] ----
    fused2 = jnp.dot(cx_bf, fused2_w[...], preferred_element_type=f32)
    ty_h = relu(fused2[:, 0:H] + brow(B_TY1))
    tr_h = relu(fused2[:, H:2 * H] + brow(B_TR1))

    # ---- type-role head ----
    type_role = relu(lin(ty_h, ty2_w, B_TY2))
    type_role = lin(type_role, ty_w, B_TY, width=r_pad)
    type_out[...] = type_role

    # ---- trigger head (no relu after the second linear) ----
    trigger_out[...] = lin(tr_h, tr2_w, B_TR2)


def init_params(key, hidden, role_num):
    """Deterministic init (nn.Linear-style). Weights stored (in, out), bias (1, out)."""
    def lin(k, n_in, n_out):
        kw, kb = jax.random.split(k)
        bound = 1.0 / math.sqrt(n_in)
        w = jax.random.uniform(kw, (n_in, n_out), jnp.float32, -bound, bound)
        b = jax.random.uniform(kb, (1, n_out), jnp.float32, -bound, bound)
        return w, b

    layer_dims = {
        "cls1": hidden, "cls2": hidden,
        "ind1": hidden, "ind2": hidden, "ind": role_num,
        "k1": hidden, "k2": hidden, "k3": hidden,
        "q1": hidden, "q2": hidden, "q3": hidden,
        "ty1": hidden, "ty2": hidden, "ty": role_num,
        "tr1": hidden, "tr2": hidden,
    }
    keys = jax.random.split(key, len(layer_dims))
    params = {name: lin(k, hidden, n_out)
              for (name, n_out), k in zip(layer_dims.items(), keys)}
    params["ln"] = (jnp.ones((1, hidden), jnp.float32),
                    jnp.zeros((1, hidden), jnp.float32))
    return params


def _pack_inputs(pooler, params, r_pad):
    """Fuse same-input heads, cast matmul weights to bf16, zero-pad the role_num
    heads to lane width, and pack all biases + LN params into one (18, W) slab."""
    H = pooler.shape[1]
    W = max(H, r_pad)
    bf16 = jnp.bfloat16

    def w(name):
        return params[name][0]

    def b(name):
        return params[name][1]

    def pad_cols(a, width):
        if a.shape[1] == width:
            return a
        return jnp.zeros((a.shape[0], width), a.dtype).at[:, :a.shape[1]].set(a)

    weights = [
        w("cls1").astype(bf16),
        w("cls2").astype(bf16),
        jnp.concatenate([w("ind1"), w("k1"), w("q1")], axis=1).astype(bf16),
        w("ind2").astype(bf16),
        pad_cols(w("ind"), r_pad).astype(bf16),
        w("k2").astype(bf16),
        w("k3").astype(bf16),
        w("q2").astype(bf16),
        w("q3").astype(bf16),
        jnp.concatenate([w("ty1"), w("tr1")], axis=1).astype(bf16),
        w("ty2").astype(bf16),
        pad_cols(w("ty"), r_pad).astype(bf16),
        w("tr2").astype(bf16),
    ]

    ln_g, ln_b = params["ln"]
    rows = [None] * NUM_BIAS_ROWS
    rows[B_CLS1], rows[B_CLS2] = b("cls1"), b("cls2")
    rows[B_IND1], rows[B_K1], rows[B_Q1] = b("ind1"), b("k1"), b("q1")
    rows[B_IND2], rows[B_IND] = b("ind2"), b("ind")
    rows[B_K2], rows[B_K3] = b("k2"), b("k3")
    rows[B_Q2], rows[B_Q3] = b("q2"), b("q3")
    rows[B_LNG], rows[B_LNB] = ln_g, ln_b
    rows[B_TY1], rows[B_TR1] = b("ty1"), b("tr1")
    rows[B_TY2], rows[B_TY] = b("ty2"), b("ty")
    rows[B_TR2] = b("tr2")
    bias_pack = jnp.concatenate(
        [pad_cols(r.astype(jnp.float32), W) for r in rows], axis=0)

    return [pooler] + weights + [bias_pack]


def role_model_forward(pooler_output, params, role_num):
    """pooler_output: (B, H) f32 features from the text encoder.

    TODO(synk): the pretrained BERT encoder (AutoModel) is not translatable to a
    Pallas kernel; this wrapper consumes its pooler_output directly.
    """
    B, H = pooler_output.shape
    R = role_num
    r_pad = max(128, ((R + 127) // 128) * 128)   # lane-dense width for R-wide heads

    flat_inputs = _pack_inputs(pooler_output, params, r_pad)

    out_shapes = (
        jax.ShapeDtypeStruct((B, H), jnp.float32),      # clust_x
        jax.ShapeDtypeStruct((B, H), jnp.float32),      # keys
        jax.ShapeDtypeStruct((B, H), jnp.float32),      # query
        jax.ShapeDtypeStruct((B, B), jnp.float32),      # S
        jax.ShapeDtypeStruct((B, H), jnp.float32),      # text_x
        jax.ShapeDtypeStruct((B, H), jnp.float32),      # trigger
        jax.ShapeDtypeStruct((B, r_pad), jnp.float32),  # indiv (lane-padded)
        jax.ShapeDtypeStruct((B, r_pad), jnp.float32),  # type_role (lane-padded)
    )

    vmem_spec = pl.BlockSpec(memory_space=pltpu.MemorySpace.VMEM)
    kernel = functools.partial(
        role_model_kernel,
        inv_sqrt_f=float(1.0 / math.sqrt(H)),
        hidden=H,
        r_pad=r_pad,
    )

    outs = pl.pallas_call(
        kernel,
        out_shape=out_shapes,
        in_specs=[vmem_spec] * len(flat_inputs),
        out_specs=tuple(vmem_spec for _ in out_shapes),
        compiler_params=pltpu.CompilerParams(
            # Raise the scoped-VMEM limit above the per-chip defaults (16 MiB on
            # v5e, 32 MiB on v6e/v7x) so production-sized bf16 weights stay
            # resident; 48 MiB stays under v7x's 64 MiB physical VMEM.
            vmem_limit_bytes=48 * 1024 * 1024,
        ),
    )(*flat_inputs)

    clust_x, keys, query, S, text_x, trigger, indiv_p, type_p = outs
    return (clust_x, keys, query, S, text_x, trigger,
            indiv_p[:, :R], type_p[:, :R])


def _reference_forward(x, params, hidden):
    """Pure-JAX f32 reference for a sanity check (uses the unfused params)."""
    def lin(v, name):
        w, b = params[name]
        return v @ w + b

    def ln(v):
        g, b = params["ln"]
        mu = jnp.mean(v, axis=-1, keepdims=True)
        var = jnp.mean((v - mu) ** 2, axis=-1, keepdims=True)
        return (v - mu) / jnp.sqrt(var + 1e-5) * g + b

    relu = lambda v: jnp.maximum(v, 0.0)

    text_x = lin(relu(lin(x, "cls1")), "cls2")
    indiv = lin(relu(lin(relu(lin(text_x, "ind1")), "ind2")), "ind")
    keys = lin(ln(relu(lin(relu(lin(text_x, "k1")), "k2"))), "k3")
    query = lin(ln(relu(lin(relu(lin(text_x, "q1")), "q2"))), "q3")
    S = query @ keys.T / jnp.sqrt(jnp.float32(hidden))
    sims = jax.nn.softmax(S, axis=1)
    clust = sims @ text_x
    type_role = lin(relu(lin(relu(lin(clust, "ty1")), "ty2")), "ty")
    trigger = lin(relu(lin(clust, "tr1")), "tr2")
    return clust, keys, query, S, text_x, trigger, indiv, type_role


if __name__ == "__main__":
    B, H, R = 8, 128, 8   # batch, hidden, role_num (small, TPU-friendly)

    root = jax.random.PRNGKey(0)
    k_params, k_x = jax.random.split(root)
    params = init_params(k_params, H, R)

    # synthetic "pooler_output" features standing in for the BERT encoder output
    pooler = jax.random.normal(k_x, (B, H), jnp.float32)

    outs = role_model_forward(pooler, params, R)
    outs = jax.block_until_ready(outs)

    refs = _reference_forward(pooler, params, H)
    names = ["clust_x", "keys", "query", "S", "text_x", "trigger", "indiv", "type_role"]
    # bf16 MXU operands + approx reciprocal => loosened tolerance vs the f32 reference
    for n, o, r in zip(names, outs, refs):
        assert o.shape == r.shape, (n, o.shape, r.shape)
        assert jnp.allclose(o, r, atol=5e-2, rtol=5e-2), \
            (n, float(jnp.max(jnp.abs(o - r))))

    print("KERNEL_OK")
</pallas_src>

<mosaic_0001>
module attributes {stable_mosaic.version = 11 : i64} {
  func.func @role_model_kernel(%arg0: memref<8x128xf32, #tpu.memory_space<vmem>>, %arg1: memref<128x128xbf16, #tpu.memory_space<vmem>>, %arg2: memref<128x128xbf16, #tpu.memory_space<vmem>>, %arg3: memref<128x384xbf16, #tpu.memory_space<vmem>>, %arg4: memref<128x128xbf16, #tpu.memory_space<vmem>>, %arg5: memref<128x128xbf16, #tpu.memory_space<vmem>>, %arg6: memref<128x128xbf16, #tpu.memory_space<vmem>>, %arg7: memref<128x128xbf16, #tpu.memory_space<vmem>>, %arg8: memref<128x128xbf16, #tpu.memory_space<vmem>>, %arg9: memref<128x128xbf16, #tpu.memory_space<vmem>>, %arg10: memref<128x256xbf16, #tpu.memory_space<vmem>>, %arg11: memref<128x128xbf16, #tpu.memory_space<vmem>>, %arg12: memref<128x128xbf16, #tpu.memory_space<vmem>>, %arg13: memref<128x128xbf16, #tpu.memory_space<vmem>>, %arg14: memref<18x128xf32, #tpu.memory_space<vmem>>, %arg15: memref<8x128xf32, #tpu.memory_space<vmem>>, %arg16: memref<8x128xf32, #tpu.memory_space<vmem>>, %arg17: memref<8x128xf32, #tpu.memory_space<vmem>>, %arg18: memref<8x8xf32, #tpu.memory_space<vmem>>, %arg19: memref<8x128xf32, #tpu.memory_space<vmem>>, %arg20: memref<8x128xf32, #tpu.memory_space<vmem>>, %arg21: memref<8x128xf32, #tpu.memory_space<vmem>>, %arg22: memref<8x128xf32, #tpu.memory_space<vmem>>) attributes {dimension_semantics = [], scalar_prefetch = 0 : i64, scratch_operands = 0 : i64, tpu.core_type = #tpu.core_type<tc>} {
    %c0 = arith.constant 0 : index
    %c0_0 = arith.constant 0 : index
    %0 = vector.load %arg0[%c0, %c0_0] : memref<8x128xf32, #tpu.memory_space<vmem>>, vector<8x128xf32>
    %1 = arith.truncf %0 : vector<8x128xf32> to vector<8x128xbf16>
    %c0_1 = arith.constant 0 : index
    %c0_2 = arith.constant 0 : index
    %2 = vector.load %arg1[%c0_1, %c0_2] : memref<128x128xbf16, #tpu.memory_space<vmem>>, vector<128x128xbf16>
    %cst = arith.constant dense<0.000000e+00> : vector<8x128xf32>
    %3 = tpu.matmul %1, %2, %cst {dimension_numbers = #tpu.dot_dimension_numbers<[1], [0], [0], [1], [0, 0, 1, 1], [], []>} : vector<8x128xbf16>, vector<128x128xbf16>, vector<8x128xf32> -> vector<8x128xf32>
    %c0_3 = arith.constant 0 : index
    %c0_4 = arith.constant 0 : index
    %4 = vector.load %arg14[%c0_3, %c0_4] : memref<18x128xf32, #tpu.memory_space<vmem>>, vector<1x128xf32>
    %5 = vector.broadcast %4 : vector<1x128xf32> to vector<8x128xf32>
    %6 = arith.addf %3, %5 : vector<8x128xf32>
    %cst_5 = arith.constant 0.000000e+00 : f32
    %7 = vector.broadcast %cst_5 : f32 to vector<8x128xf32>
    %8 = arith.maximumf %6, %7 : vector<8x128xf32>
    %9 = arith.truncf %8 : vector<8x128xf32> to vector<8x128xbf16>
    %c0_6 = arith.constant 0 : index
    %c0_7 = arith.constant 0 : index
    %10 = vector.load %arg2[%c0_6, %c0_7] : memref<128x128xbf16, #tpu.memory_space<vmem>>, vector<128x128xbf16>
    %cst_8 = arith.constant dense<0.000000e+00> : vector<8x128xf32>
    %11 = tpu.matmul %9, %10, %cst_8 {dimension_numbers = #tpu.dot_dimension_numbers<[1], [0], [0], [1], [0, 0, 1, 1], [], []>} : vector<8x128xbf16>, vector<128x128xbf16>, vector<8x128xf32> -> vector<8x128xf32>
    %c1 = arith.constant 1 : index
    %c0_9 = arith.constant 0 : index
    %12 = vector.load %arg14[%c1, %c0_9] : memref<18x128xf32, #tpu.memory_space<vmem>>, vector<1x128xf32>
    %13 = vector.broadcast %12 : vector<1x128xf32> to vector<8x128xf32>
    %14 = arith.addf %11, %13 : vector<8x128xf32>
    %c0_10 = arith.constant 0 : index
    %c0_11 = arith.constant 0 : index
    %15 = vector.load %arg19[%c0_10, %c0_11] : memref<8x128xf32, #tpu.memory_space<vmem>>, vector<8x128xf32>
    tpu.vector_store %arg19[%c0_10, %c0_11], %14 {strides = array<i32>} : memref<8x128xf32, #tpu.memory_space<vmem>>, vector<8x128xf32>,
    %16 = arith.truncf %14 : vector<8x128xf32> to vector<8x128xbf16>
    %c0_12 = arith.constant 0 : index
    %c0_13 = arith.constant 0 : index
    %17 = vector.load %arg3[%c0_12, %c0_13] : memref<128x384xbf16, #tpu.memory_space<vmem>>, vector<128x384xbf16>
    %cst_14 = arith.constant dense<0.000000e+00> : vector<8x384xf32>
    %18 = tpu.matmul %16, %17, %cst_14 {dimension_numbers = #tpu.dot_dimension_numbers<[1], [0], [0], [1], [0, 0, 1, 1], [], []>} : vector<8x128xbf16>, vector<128x384xbf16>, vector<8x384xf32> -> vector<8x384xf32>
    %19 = vector.extract_strided_slice %18 {offsets = [0, 0], sizes = [8, 128], strides = [1, 1]} : vector<8x384xf32> to vector<8x128xf32>
    %c2 = arith.constant 2 : index
    %c0_15 = arith.constant 0 : index
    %20 = vector.load %arg14[%c2, %c0_15] : memref<18x128xf32, #tpu.memory_space<vmem>>, vector<1x128xf32>
    %21 = vector.broadcast %20 : vector<1x128xf32> to vector<8x128xf32>
    %22 = arith.addf %19, %21 : vector<8x128xf32>
    %cst_16 = arith.constant 0.000000e+00 : f32
    %23 = vector.broadcast %cst_16 : f32 to vector<8x128xf32>
    %24 = arith.maximumf %22, %23 : vector<8x128xf32>
    %25 = vector.extract_strided_slice %18 {offsets = [0, 128], sizes = [8, 128], strides = [1, 1]} : vector<8x384xf32> to vector<8x128xf32>
    %c3 = arith.constant 3 : index
    %c0_17 = arith.constant 0 : index
    %26 = vector.load %arg14[%c3, %c0_17] : memref<18x128xf32, #tpu.memory_space<vmem>>, vector<1x128xf32>
    %27 = vector.broadcast %26 : vector<1x128xf32> to vector<8x128xf32>
    %28 = arith.addf %25, %27 : vector<8x128xf32>
    %cst_18 = arith.constant 0.000000e+00 : f32
    %29 = vector.broadcast %cst_18 : f32 to vector<8x128xf32>
    %30 = arith.maximumf %28, %29 : vector<8x128xf32>
    %31 = vector.extract_strided_slice %18 {offsets = [0, 256], sizes = [8, 128], strides = [1, 1]} : vector<8x384xf32> to vector<8x128xf32>
    %c4 = arith.constant 4 : index
    %c0_19 = arith.constant 0 : index
    %32 = vector.load %arg14[%c4, %c0_19] : memref<18x128xf32, #tpu.memory_space<vmem>>, vector<1x128xf32>
    %33 = vector.broadcast %32 : vector<1x128xf32> to vector<8x128xf32>
    %34 = arith.addf %31, %33 : vector<8x128xf32>
    %cst_20 = arith.constant 0.000000e+00 : f32
    %35 = vector.broadcast %cst_20 : f32 to vector<8x128xf32>
    %36 = arith.maximumf %34, %35 : vector<8x128xf32>
    %37 = arith.truncf %24 : vector<8x128xf32> to vector<8x128xbf16>
    %c0_21 = arith.constant 0 : index
    %c0_22 = arith.constant 0 : index
    %38 = vector.load %arg4[%c0_21, %c0_22] : memref<128x128xbf16, #tpu.memory_space<vmem>>, vector<128x128xbf16>
    %cst_23 = arith.constant dense<0.000000e+00> : vector<8x128xf32>
    %39 = tpu.matmul %37, %38, %cst_23 {dimension_numbers = #tpu.dot_dimension_numbers<[1], [0], [0], [1], [0, 0, 1, 1], [], []>} : vector<8x128xbf16>, vector<128x128xbf16>, vector<8x128xf32> -> vector<8x128xf32>
    %c5 = arith.constant 5 : index
    %c0_24 = arith.constant 0 : index
    %40 = vector.load %arg14[%c5, %c0_24] : memref<18x128xf32, #tpu.memory_space<vmem>>, vector<1x128xf32>
    %41 = vector.broadcast %40 : vector<1x128xf32> to vector<8x128xf32>
    %42 = arith.addf %39, %41 : vector<8x128xf32>
    %cst_25 = arith.constant 0.000000e+00 : f32
    %43 = vector.broadcast %cst_25 : f32 to vector<8x128xf32>
    %44 = arith.maximumf %42, %43 : vector<8x128xf32>
    %45 = arith.truncf %44 : vector<8x128xf32> to vector<8x128xbf16>
    %c0_26 = arith.constant 0 : index
    %c0_27 = arith.constant 0 : index
    %46 = vector.load %arg5[%c0_26, %c0_27] : memref<128x128xbf16, #tpu.memory_space<vmem>>, vector<128x128xbf16>
    %cst_28 = arith.constant dense<0.000000e+00> : vector<8x128xf32>
    %47 = tpu.matmul %45, %46, %cst_28 {dimension_numbers = #tpu.dot_dimension_numbers<[1], [0], [0], [1], [0, 0, 1, 1], [], []>} : vector<8x128xbf16>, vector<128x128xbf16>, vector<8x128xf32> -> vector<8x128xf32>
    %c6 = arith.constant 6 : index
    %c0_29 = arith.constant 0 : index
    %48 = vector.load %arg14[%c6, %c0_29] : memref<18x128xf32, #tpu.memory_space<vmem>>, vector<1x128xf32>
    %49 = vector.broadcast %48 : vector<1x128xf32> to vector<8x128xf32>
    %50 = arith.addf %47, %49 : vector<8x128xf32>
    %c0_30 = arith.constant 0 : index
    %c0_31 = arith.constant 0 : index
    %51 = vector.load %arg21[%c0_30, %c0_31] : memref<8x128xf32, #tpu.memory_space<vmem>>, vector<8x128xf32>
    tpu.vector_store %arg21[%c0_30, %c0_31], %50 {strides = array<i32>} : memref<8x128xf32, #tpu.memory_space<vmem>>, vector<8x128xf32>,
    %c11 = arith.constant 11 : index
    %c0_32 = arith.constant 0 : index
    %52 = vector.load %arg14[%c11, %c0_32] : memref<18x128xf32, #tpu.memory_space<vmem>>, vector<1x128xf32>
    %c12 = arith.constant 12 : index
    %c0_33 = arith.constant 0 : index
    %53 = vector.load %arg14[%c12, %c0_33] : memref<18x128xf32, #tpu.memory_space<vmem>>, vector<1x128xf32>
    %54 = arith.truncf %30 : vector<8x128xf32> to vector<8x128xbf16>
    %c0_34 = arith.constant 0 : index
    %c0_35 = arith.constant 0 : index
    %55 = vector.load %arg6[%c0_34, %c0_35] : memref<128x128xbf16, #tpu.memory_space<vmem>>, vector<128x128xbf16>
    %cst_36 = arith.constant dense<0.000000e+00> : vector<8x128xf32>
    %56 = tpu.matmul %54, %55, %cst_36 {dimension_numbers = #tpu.dot_dimension_numbers<[1], [0], [0], [1], [0, 0, 1, 1], [], []>} : vector<8x128xbf16>, vector<128x128xbf16>, vector<8x128xf32> -> vector<8x128xf32>
    %c7 = arith.constant 7 : index
    %c0_37 = arith.constant 0 : index
    %57 = vector.load %arg14[%c7, %c0_37] : memref<18x128xf32, #tpu.memory_space<vmem>>, vector<1x128xf32>
    %58 = vector.broadcast %57 : vector<1x128xf32> to vector<8x128xf32>
    %59 = arith.addf %56, %58 : vector<8x128xf32>
    %cst_38 = arith.constant 0.000000e+00 : f32
    %60 = vector.broadcast %cst_38 : f32 to vector<8x128xf32>
    %61 = arith.maximumf %59, %60 : vector<8x128xf32>
    %cst_39 = arith.constant dense<0.000000e+00> : vector<8xf32>
    %62 = vector.multi_reduction <add>, %61, %cst_39 [1] : vector<8x128xf32> to vector<8xf32>
    %63 = vector.shape_cast %62 : vector<8xf32> to vector<8x1xf32>
    %cst_40 = arith.constant 1.280000e+02 : f32
    %64 = vector.broadcast %cst_40 : f32 to vector<8x1xf32>
    %65 = arith.divf %63, %64 : vector<8x1xf32>
    %66 = vector.broadcast %65 : vector<8x1xf32> to vector<8x128xf32>
    %67 = arith.subf %61, %66 : vector<8x128xf32>
    %68 = arith.mulf %67, %67 : vector<8x128xf32>
    %cst_41 = arith.constant dense<0.000000e+00> : vector<8xf32>
    %69 = vector.multi_reduction <add>, %68, %cst_41 [1] : vector<8x128xf32> to vector<8xf32>
    %70 = vector.shape_cast %69 : vector<8xf32> to vector<8x1xf32>
    %cst_42 = arith.constant 1.280000e+02 : f32
    %71 = vector.broadcast %cst_42 : f32 to vector<8x1xf32>
    %72 = arith.divf %70, %71 : vector<8x1xf32>
    %cst_43 = arith.constant 9.99999974E-6 : f32
    %73 = vector.broadcast %cst_43 : f32 to vector<8x1xf32>
    %74 = arith.addf %72, %73 : vector<8x1xf32>
    %75 = math.rsqrt %74 : vector<8x1xf32>
    %76 = vector.broadcast %75 : vector<8x1xf32> to vector<8x128xf32>
    %77 = arith.mulf %67, %76 : vector<8x128xf32>
    %78 = vector.broadcast %52 : vector<1x128xf32> to vector<8x128xf32>
    %79 = arith.mulf %77, %78 : vector<8x128xf32>
    %80 = vector.broadcast %53 : vector<1x128xf32> to vector<8x128xf32>
    %81 = arith.addf %79, %80 : vector<8x128xf32>
    %82 = arith.truncf %81 : vector<8x128xf32> to vector<8x128xbf16>
    %c0_44 = arith.constant 0 : index
    %c0_45 = arith.constant 0 : index
    %83 = vector.load %arg7[%c0_44, %c0_45] : memref<128x128xbf16, #tpu.memory_space<vmem>>, vector<128x128xbf16>
    %cst_46 = arith.constant dense<0.000000e+00> : vector<8x128xf32>
    %84 = tpu.matmul %82, %83, %cst_46 {dimension_numbers = #tpu.dot_dimension_numbers<[1], [0], [0], [1], [0, 0, 1, 1], [], []>} : vector<8x128xbf16>, vector<128x128xbf16>, vector<8x128xf32> -> vector<8x128xf32>
    %c8 = arith.constant 8 : index
    %c0_47 = arith.constant 0 : index
    %85 = vector.load %arg14[%c8, %c0_47] : memref<18x128xf32, #tpu.memory_space<vmem>>, vector<1x128xf32>
    %86 = vector.broadcast %85 : vector<1x128xf32> to vector<8x128xf32>
    %87 = arith.addf %84, %86 : vector<8x128xf32>
    %c0_48 = arith.constant 0 : index
    %c0_49 = arith.constant 0 : index
    %88 = vector.load %arg16[%c0_48, %c0_49] : memref<8x128xf32, #tpu.memory_space<vmem>>, vector<8x128xf32>
    tpu.vector_store %arg16[%c0_48, %c0_49], %87 {strides = array<i32>} : memref<8x128xf32, #tpu.memory_space<vmem>>, vector<8x128xf32>,
    %89 = arith.truncf %36 : vector<8x128xf32> to vector<8x128xbf16>
    %c0_50 = arith.constant 0 : index
    %c0_51 = arith.constant 0 : index
    %90 = vector.load %arg8[%c0_50, %c0_51] : memref<128x128xbf16, #tpu.memory_space<vmem>>, vector<128x128xbf16>
    %cst_52 = arith.constant dense<0.000000e+00> : vector<8x128xf32>
    %91 = tpu.matmul %89, %90, %cst_52 {dimension_numbers = #tpu.dot_dimension_numbers<[1], [0], [0], [1], [0, 0, 1, 1], [], []>} : vector<8x128xbf16>, vector<128x128xbf16>, vector<8x128xf32> -> vector<8x128xf32>
    %c9 = arith.constant 9 : index
    %c0_53 = arith.constant 0 : index
    %92 = vector.load %arg14[%c9, %c0_53] : memref<18x128xf32, #tpu.memory_space<vmem>>, vector<1x128xf32>
    %93 = vector.broadcast %92 : vector<1x128xf32> to vector<8x128xf32>
    %94 = arith.addf %91, %93 : vector<8x128xf32>
    %cst_54 = arith.constant 0.000000e+00 : f32
    %95 = vector.broadcast %cst_54 : f32 to vector<8x128xf32>
    %96 = arith.maximumf %94, %95 : vector<8x128xf32>
    %cst_55 = arith.constant dense<0.000000e+00> : vector<8xf32>
    %97 = vector.multi_reduction <add>, %96, %cst_55 [1] : vector<8x128xf32> to vector<8xf32>
    %98 = vector.shape_cast %97 : vector<8xf32> to vector<8x1xf32>
    %cst_56 = arith.constant 1.280000e+02 : f32
    %99 = vector.broadcast %cst_56 : f32 to vector<8x1xf32>
    %100 = arith.divf %98, %99 : vector<8x1xf32>
    %101 = vector.broadcast %100 : vector<8x1xf32> to vector<8x128xf32>
    %102 = arith.subf %96, %101 : vector<8x128xf32>
    %103 = arith.mulf %102, %102 : vector<8x128xf32>
    %cst_57 = arith.constant dense<0.000000e+00> : vector<8xf32>
    %104 = vector.multi_reduction <add>, %103, %cst_57 [1] : vector<8x128xf32> to vector<8xf32>
    %105 = vector.shape_cast %104 : vector<8xf32> to vector<8x1xf32>
    %cst_58 = arith.constant 1.280000e+02 : f32
    %106 = vector.broadcast %cst_58 : f32 to vector<8x1xf32>
    %107 = arith.divf %105, %106 : vector<8x1xf32>
    %cst_59 = arith.constant 9.99999974E-6 : f32
    %108 = vector.broadcast %cst_59 : f32 to vector<8x1xf32>
    %109 = arith.addf %107, %108 : vector<8x1xf32>
    %110 = math.rsqrt %109 : vector<8x1xf32>
    %111 = vector.broadcast %110 : vector<8x1xf32> to vector<8x128xf32>
    %112 = arith.mulf %102, %111 : vector<8x128xf32>
    %113 = vector.broadcast %52 : vector<1x128xf32> to vector<8x128xf32>
    %114 = arith.mulf %112, %113 : vector<8x128xf32>
    %115 = vector.broadcast %53 : vector<1x128xf32> to vector<8x128xf32>
    %116 = arith.addf %114, %115 : vector<8x128xf32>
    %117 = arith.truncf %116 : vector<8x128xf32> to vector<8x128xbf16>
    %c0_60 = arith.constant 0 : index
    %c0_61 = arith.constant 0 : index
    %118 = vector.load %arg9[%c0_60, %c0_61] : memref<128x128xbf16, #tpu.memory_space<vmem>>, vector<128x128xbf16>
    %cst_62 = arith.constant dense<0.000000e+00> : vector<8x128xf32>
    %119 = tpu.matmul %117, %118, %cst_62 {dimension_numbers = #tpu.dot_dimension_numbers<[1], [0], [0], [1], [0, 0, 1, 1], [], []>} : vector<8x128xbf16>, vector<128x128xbf16>, vector<8x128xf32> -> vector<8x128xf32>
    %c10 = arith.constant 10 : index
    %c0_63 = arith.constant 0 : index
    %120 = vector.load %arg14[%c10, %c0_63] : memref<18x128xf32, #tpu.memory_space<vmem>>, vector<1x128xf32>
    %121 = vector.broadcast %120 : vector<1x128xf32> to vector<8x128xf32>
    %122 = arith.addf %119, %121 : vector<8x128xf32>
    %c0_64 = arith.constant 0 : index
    %c0_65 = arith.constant 0 : index
    %123 = vector.load %arg17[%c0_64, %c0_65] : memref<8x128xf32, #tpu.memory_space<vmem>>, vector<8x128xf32>
    tpu.vector_store %arg17[%c0_64, %c0_65], %122 {strides = array<i32>} : memref<8x128xf32, #tpu.memory_space<vmem>>, vector<8x128xf32>,
    %124 = arith.truncf %122 : vector<8x128xf32> to vector<8x128xbf16>
    %125 = arith.truncf %87 : vector<8x128xf32> to vector<8x128xbf16>
    %cst_66 = arith.constant dense<0.000000e+00> : vector<8x8xf32>
    %126 = tpu.matmul %124, %125, %cst_66 {dimension_numbers = #tpu.dot_dimension_numbers<[1], [1], [0], [0], [0, 0, 1, 0], [], []>} : vector<8x128xbf16>, vector<8x128xbf16>, vector<8x8xf32> -> vector<8x8xf32>
    %cst_67 = arith.constant 0.0883883461 : f32
    %127 = vector.broadcast %cst_67 : f32 to vector<8x8xf32>
    %128 = arith.mulf %126, %127 : vector<8x8xf32>
    %c0_68 = arith.constant 0 : index
    %c0_69 = arith.constant 0 : index
    %129 = vector.load %arg18[%c0_68, %c0_69] : memref<8x8xf32, #tpu.memory_space<vmem>>, vector<8x8xf32>
    tpu.vector_store %arg18[%c0_68, %c0_69], %128 {strides = array<i32>} : memref<8x8xf32, #tpu.memory_space<vmem>>, vector<8x8xf32>,
    %cst_70 = arith.constant dense<0xFF800000> : vector<8xf32>
    %130 = vector.multi_reduction <maximumf>, %128, %cst_70 [1] : vector<8x8xf32> to vector<8xf32>
    %131 = vector.shape_cast %130 : vector<8xf32> to vector<8x1xf32>
    %132 = vector.broadcast %131 : vector<8x1xf32> to vector<8x8xf32>
    %133 = arith.subf %128, %132 : vector<8x8xf32>
    %134 = math.exp %133 : vector<8x8xf32>
    %cst_71 = arith.constant dense<0.000000e+00> : vector<8xf32>
    %135 = vector.multi_reduction <add>, %134, %cst_71 [1] : vector<8x8xf32> to vector<8xf32>
    %136 = vector.shape_cast %135 : vector<8xf32> to vector<8x1xf32>
    %137 = tpu.reciprocal %136 {approx = true} : vector<8x1xf32> -> vector<8x1xf32>
    %138 = vector.broadcast %137 : vector<8x1xf32> to vector<8x8xf32>
    %139 = arith.mulf %134, %138 : vector<8x8xf32>
    %140 = arith.truncf %139 : vector<8x8xf32> to vector<8x8xbf16>
    %cst_72 = arith.constant dense<0.000000e+00> : vector<8x128xf32>
    %141 = tpu.matmul %140, %16, %cst_72 {dimension_numbers = #tpu.dot_dimension_numbers<[1], [0], [0], [1], [0, 0, 1, 1], [], []>} : vector<8x8xbf16>, vector<8x128xbf16>, vector<8x128xf32> -> vector<8x128xf32>
    %c0_73 = arith.constant 0 : index
    %c0_74 = arith.constant 0 : index
    %142 = vector.load %arg15[%c0_73, %c0_74] : memref<8x128xf32, #tpu.memory_space<vmem>>, vector<8x128xf32>
    tpu.vector_store %arg15[%c0_73, %c0_74], %141 {strides = array<i32>} : memref<8x128xf32, #tpu.memory_space<vmem>>, vector<8x128xf32>,
    %143 = arith.truncf %141 : vector<8x128xf32> to vector<8x128xbf16>
    %c0_75 = arith.constant 0 : index
    %c0_76 = arith.constant 0 : index
    %144 = vector.load %arg10[%c0_75, %c0_76] : memref<128x256xbf16, #tpu.memory_space<vmem>>, vector<128x256xbf16>
    %cst_77 = arith.constant dense<0.000000e+00> : vector<8x256xf32>
    %145 = tpu.matmul %143, %144, %cst_77 {dimension_numbers = #tpu.dot_dimension_numbers<[1], [0], [0], [1], [0, 0, 1, 1], [], []>} : vector<8x128xbf16>, vector<128x256xbf16>, vector<8x256xf32> -> vector<8x256xf32>
    %146 = vector.extract_strided_slice %145 {offsets = [0, 0], sizes = [8, 128], strides = [1, 1]} : vector<8x256xf32> to vector<8x128xf32>
    %c13 = arith.constant 13 : index
    %c0_78 = arith.constant 0 : index
    %147 = vector.load %arg14[%c13, %c0_78] : memref<18x128xf32, #tpu.memory_space<vmem>>, vector<1x128xf32>
    %148 = vector.broadcast %147 : vector<1x128xf32> to vector<8x128xf32>
    %149 = arith.addf %146, %148 : vector<8x128xf32>
    %cst_79 = arith.constant 0.000000e+00 : f32
    %150 = vector.broadcast %cst_79 : f32 to vector<8x128xf32>
    %151 = arith.maximumf %149, %150 : vector<8x128xf32>
    %152 = vector.extract_strided_slice %145 {offsets = [0, 128], sizes = [8, 128], strides = [1, 1]} : vector<8x256xf32> to vector<8x128xf32>
    %c14 = arith.constant 14 : index
    %c0_80 = arith.constant 0 : index
    %153 = vector.load %arg14[%c14, %c0_80] : memref<18x128xf32, #tpu.memory_space<vmem>>, vector<1x128xf32>
    %154 = vector.broadcast %153 : vector<1x128xf32> to vector<8x128xf32>
    %155 = arith.addf %152, %154 : vector<8x128xf32>
    %cst_81 = arith.constant 0.000000e+00 : f32
    %156 = vector.broadcast %cst_81 : f32 to vector<8x128xf32>
    %157 = arith.maximumf %155, %156 : vector<8x128xf32>
    %158 = arith.truncf %151 : vector<8x128xf32> to vector<8x128xbf16>
    %c0_82 = arith.constant 0 : index
    %c0_83 = arith.constant 0 : index
    %159 = vector.load %arg11[%c0_82, %c0_83] : memref<128x128xbf16, #tpu.memory_space<vmem>>, vector<128x128xbf16>
    %cst_84 = arith.constant dense<0.000000e+00> : vector<8x128xf32>
    %160 = tpu.matmul %158, %159, %cst_84 {dimension_numbers = #tpu.dot_dimension_numbers<[1], [0], [0], [1], [0, 0, 1, 1], [], []>} : vector<8x128xbf16>, vector<128x128xbf16>, vector<8x128xf32> -> vector<8x128xf32>
    %c15 = arith.constant 15 : index
    %c0_85 = arith.constant 0 : index
    %161 = vector.load %arg14[%c15, %c0_85] : memref<18x128xf32, #tpu.memory_space<vmem>>, vector<1x128xf32>
    %162 = vector.broadcast %161 : vector<1x128xf32> to vector<8x128xf32>
    %163 = arith.addf %160, %162 : vector<8x128xf32>
    %cst_86 = arith.constant 0.000000e+00 : f32
    %164 = vector.broadcast %cst_86 : f32 to vector<8x128xf32>
    %165 = arith.maximumf %163, %164 : vector<8x128xf32>
    %166 = arith.truncf %165 : vector<8x128xf32> to vector<8x128xbf16>
    %c0_87 = arith.constant 0 : index
    %c0_88 = arith.constant 0 : index
    %167 = vector.load %arg12[%c0_87, %c0_88] : memref<128x128xbf16, #tpu.memory_space<vmem>>, vector<128x128xbf16>
    %cst_89 = arith.constant dense<0.000000e+00> : vector<8x128xf32>
    %168 = tpu.matmul %166, %167, %cst_89 {dimension_numbers = #tpu.dot_dimension_numbers<[1], [0], [0], [1], [0, 0, 1, 1], [], []>} : vector<8x128xbf16>, vector<128x128xbf16>, vector<8x128xf32> -> vector<8x128xf32>
    %c16 = arith.constant 16 : index
    %c0_90 = arith.constant 0 : index
    %169 = vector.load %arg14[%c16, %c0_90] : memref<18x128xf32, #tpu.memory_space<vmem>>, vector<1x128xf32>
    %170 = vector.broadcast %169 : vector<1x128xf32> to vector<8x128xf32>
    %171 = arith.addf %168, %170 : vector<8x128xf32>
    %c0_91 = arith.constant 0 : index
    %c0_92 = arith.constant 0 : index
    %172 = vector.load %arg22[%c0_91, %c0_92] : memref<8x128xf32, #tpu.memory_space<vmem>>, vector<8x128xf32>
    tpu.vector_store %arg22[%c0_91, %c0_92], %171 {strides = array<i32>} : memref<8x128xf32, #tpu.memory_space<vmem>>, vector<8x128xf32>,
    %173 = arith.truncf %157 : vector<8x128xf32> to vector<8x128xbf16>
    %c0_93 = arith.constant 0 : index
    %c0_94 = arith.constant 0 : index
    %174 = vector.load %arg13[%c0_93, %c0_94] : memref<128x128xbf16, #tpu.memory_space<vmem>>, vector<128x128xbf16>
    %cst_95 = arith.constant dense<0.000000e+00> : vector<8x128xf32>
    %175 = tpu.matmul %173, %174, %cst_95 {dimension_numbers = #tpu.dot_dimension_numbers<[1], [0], [0], [1], [0, 0, 1, 1], [], []>} : vector<8x128xbf16>, vector<128x128xbf16>, vector<8x128xf32> -> vector<8x128xf32>
    %c17 = arith.constant 17 : index
    %c0_96 = arith.constant 0 : index
    %176 = vector.load %arg14[%c17, %c0_96] : memref<18x128xf32, #tpu.memory_space<vmem>>, vector<1x128xf32>
    %177 = vector.broadcast %176 : vector<1x128xf32> to vector<8x128xf32>
    %178 = arith.addf %175, %177 : vector<8x128xf32>
    %c0_97 = arith.constant 0 : index
    %c0_98 = arith.constant 0 : index
    %179 = vector.load %arg20[%c0_97, %c0_98] : memref<8x128xf32, #tpu.memory_space<vmem>>, vector<8x128xf32>
    tpu.vector_store %arg20[%c0_97, %c0_98], %178 {strides = array<i32>} : memref<8x128xf32, #tpu.memory_space<vmem>>, vector<8x128xf32>,
    return
  }
}

</mosaic_0001>

<bundles_post_ra>
// kernel: tpu_custom_call.1
= control target key start
LH: loop header
LB: loop body
LE: loop exit
PB: predicated region body
PF: predicated region fallthrough
CT: control target
= control target key end

     0   :  { %s4028_s0 = inlined_call_operand.hbm [shape: f32[8,128], index: 0, kind: input, shape index: {}]   ;;  %s4029_s1 = inlined_call_operand.hbm [shape: bf16[128,128], index: 1, kind: input, shape index: {}]   ;;  %s4030_s2 = inlined_call_operand.hbm [shape: bf16[128,128], index: 2, kind: input, shape index: {}]   ;;  %s4031_s3 = inlined_call_operand.hbm [shape: bf16[128,384], index: 3, kind: input, shape index: {}]   ;;  %s4032_s4 = inlined_call_operand.hbm [shape: bf16[128,128], index: 4, kind: input, shape index: {}]   ;;  %s4033_s5 = inlined_call_operand.hbm [shape: bf16[128,128], index: 5, kind: input, shape index: {}]   ;;  %s4034_s6 = inlined_call_operand.hbm [shape: bf16[128,128], index: 6, kind: input, shape index: {}]   ;;  %s4035_s7 = inlined_call_operand.hbm [shape: bf16[128,128], index: 7, kind: input, shape index: {}]   ;;  %s4036_s8 = inlined_call_operand.hbm [shape: bf16[128,128], index: 8, kind: input, shape index: {}]   ;;  %s4037_s9 = inlined_call_operand.hbm [shape: bf16[128,128], index: 9, kind: input, shape index: {}]   ;;  %s4038_s10 = inlined_call_operand.hbm [shape: bf16[128,256], index: 10, kind: input, shape index: {}]   ;;  %s4039_s11 = inlined_call_operand.hbm [shape: bf16[128,128], index: 11, kind: input, shape index: {}]   ;;  %s4040_s12 = inlined_call_operand.hbm [shape: bf16[128,128], index: 12, kind: input, shape index: {}]   ;;  %s4041_s13 = inlined_call_operand.hbm [shape: bf16[128,128], index: 13, kind: input, shape index: {}]   ;;  %s4042_s14 = inlined_call_operand.vmem [shape: f32[18,128], index: 14, kind: input, shape index: {}]   ;;  %s4043_s15 = inlined_call_operand.hbm [shape: f32[8,128], index: 15, kind: output, shape index: {0}]   ;;  %s4044_s16 = inlined_call_operand.hbm [shape: f32[8,128], index: 16, kind: output, shape index: {1}]   ;;  %s4045_s17 = inlined_call_operand.hbm [shape: f32[8,128], index: 17, kind: output, shape index: {2}]   ;;  %s4046_s18 = inlined_call_operand.hbm [shape: f32[8,8], index: 18, kind: output, shape index: {3}]   ;;  %s4047_s19 = inlined_call_operand.hbm [shape: f32[8,128], index: 19, kind: output, shape index: {4}]   ;;  %s4048_s20 = inlined_call_operand.hbm [shape: f32[8,128], index: 20, kind: output, shape index: {5}]   ;;  %s4049_s21 = inlined_call_operand.hbm [shape: f32[8,128], index: 21, kind: output, shape index: {6}]   ;;  %s4050_s22 = inlined_call_operand.hbm [shape: f32[8,128], index: 22, kind: output, shape index: {7}]  }
   0x1   :  { %4065 = sst [smem:[#allocation50_spill]] %s4028_s0 }
   0x2   :  { %4066 = sst [smem:[#allocation51_spill]] %s4029_s1 }
   0x3   :  { %4067 = sst [smem:[#allocation52_spill]] %s4030_s2 }
   0x4   :  { %4068 = sst [smem:[#allocation53_spill]] %s4031_s3 }
   0x5   :  { %4069 = sst [smem:[#allocation54_spill]] %s4032_s4 }
   0x6   :  { %4070 = sst [smem:[#allocation55_spill]] %s4033_s5 }
   0x7   :  { %4071 = sst [smem:[#allocation56_spill]] %s4034_s6 }
   0x8   :  { %4072 = sst [smem:[#allocation57_spill]] %s4047_s19 }
   0x9   :  { %4073 = sst [smem:[#allocation58_spill]] %s4049_s21 }
   0xa   :  { %4074 = sst [smem:[#allocation59_spill]] %s4050_s22 }
   0xb   :  { %28 = vsyncpa [#allocation3], 0 }
   0xc   :  { %29 = vsyncpa [#allocation6], 0 }
   0xd   :  { %30 = vsyncpa [#allocation9], 0 }
   0xe   :  { %31 = vsyncpa [#allocation12], 0 }
   0xf   :  { %32 = vsyncpa [#allocation15], 0 }
  0x10   :  { %33 = vsyncpa [#allocation18], 0 }
  0x11   :  { %34 = vsyncpa [#allocation21], 0 }
  0x12   :  { %35 = vsyncpa [#allocation24], 0 }
  0x13   :  { %36 = vsyncpa [#allocation4], 0 }
  0x14   :  { %37 = vsyncpa [#allocation27], 0 }
  0x15   :  { %38 = vsyncpa [#allocation30], 0 }
  0x16   :  { %39 = vsyncpa [#allocation33], 0 }
  0x17   :  { %40 = vsyncpa [#allocation36], 0  ;;  %s3352_s3 = smov [#allocation5]   ;;  %s4075_s4 = sld [smem:[#allocation51_spill]] }
  0x18   :  { %s56_s28 = sshll.u32 %s3352_s3, 4  ;;  %s57_s28 = int_to_ptr.vmem [resolvable:$true] %s56_s28 }
  0x1d   :  { %s2842_s0 = scalar_lea.hbm %s4075_s4, 1024 }
  0x1e   :  { %p2843_p0 = scmp.ne.s32.totalorder %s4075_s4, %s2842_s0  ;;  %p2846_p1 = scmp.lt.u32.totalorder %s2842_s0, %s4075_s4 }
  0x20   :  { %p2848_p2 = pnand %p2846_p1, %p2843_p0 }
  0x22   :  { %2851 = shalt.err (!%p2848_p2)
}
  0x23   :  { %s2852_s6 = scalar_lea.vmem %s57_s28, 1024  ;;  %p2857_p4 = scmp.lt.s32.totalorder %s57_s28, %s57_s28 }
  0x24   :  { %p2853_p3 = scmp.ne.s32.totalorder %s57_s28, %s2852_s6  ;;  %p2858_p5 = scmp.lt.s32.totalorder %s2852_s6, %s2852_s6 }
  0x26   :  { %p2859_p6 = por %p2858_p5, %p2857_p4 }
  0x28   :  { %p2860_p7 = pnand %p2859_p6, %p2853_p3 }
  0x2a   :  { %2863 = shalt.err (!%p2860_p7)
}
  0x2b   :  { %s4060_s25 = smov 64   ;;  %s4062_s26 = smov 4  }
  0x2c   :  { %62 = dma.hbm_to_vmem [thread:$0]  %s4075_s4, 1024, %s57_s28, [#allocation6], %s4060_s25, %s4060_s25, %s4062_s26  }
  0x2d   :  { %s3355_s3 = smov [#allocation8]   ;;  %s4076_s23 = sld [smem:[#allocation53_spill]] }
  0x2e   :  { %s80_s29 = sshll.u32 %s3355_s3, 4  ;;  %s81_s29 = int_to_ptr.vmem [resolvable:$true] %s80_s29 }
  0x33   :  { %s2864_s1 = scalar_lea.hbm %s4076_s23, 3072 }
  0x34   :  { %p2865_p8 = scmp.ne.s32.totalorder %s4076_s23, %s2864_s1  ;;  %p2868_p9 = scmp.lt.u32.totalorder %s2864_s1, %s4076_s23 }
  0x36   :  { %p2870_p10 = pnand %p2868_p9, %p2865_p8 }
  0x38   :  { %2873 = shalt.err (!%p2870_p10)
}
  0x39   :  { %s2874_s21 = scalar_lea.vmem %s81_s29, 3072  ;;  %p2879_p12 = scmp.lt.s32.totalorder %s81_s29, %s81_s29 }
  0x3a   :  { %p2875_p11 = scmp.ne.s32.totalorder %s81_s29, %s2874_s21  ;;  %p2880_p13 = scmp.lt.s32.totalorder %s2874_s21, %s2874_s21 }
  0x3c   :  { %p2881_p0 = por %p2880_p13, %p2879_p12 }
  0x3e   :  { %p2882_p1 = pnand %p2881_p0, %p2875_p11 }
  0x40   :  { %2885 = shalt.err (!%p2882_p1)
}
  0x41   :  { %s3356_s28 = smov 192   ;;  %s3357_s4 = smov 12  }
  0x42   :  { %86 = dma.hbm_to_vmem [thread:$0]  %s4076_s23, 3072, %s81_s29, [#allocation9], %s3356_s28, %s3356_s28, %s3357_s4  }
  0x43   :  { %s3358_s3 = smov [#allocation11]   ;;  %s3359_s0 = smov [#allocation14]  }
  0x44   :  { %s104_s30 = sshll.u32 %s3358_s3, 4  ;;  %s128_s22 = sshll.u32 %s3359_s0, 4  ;;  %s105_s30 = int_to_ptr.vmem [resolvable:$true] %s104_s30  ;;  %s3525_s22 = int_to_ptr.vmem [resolvable:$true] %s128_s22 }
  0x45   :  { %s4077_s24 = sld [smem:[#allocation55_spill]] }
  0x4b   :  { %s2886_s21 = scalar_lea.hbm %s4077_s24, 1024 }
  0x4c   :  { %p2887_p2 = scmp.ne.s32.totalorder %s4077_s24, %s2886_s21  ;;  %p2890_p3 = scmp.lt.u32.totalorder %s2886_s21, %s4077_s24 }
  0x4e   :  { %p2892_p4 = pnand %p2890_p3, %p2887_p2 }
  0x50   :  { %2895 = shalt.err (!%p2892_p4)
}
  0x51   :  { %s2896_s29 = scalar_lea.vmem %s105_s30, 1024  ;;  %p2901_p6 = scmp.lt.s32.totalorder %s105_s30, %s105_s30 }
  0x52   :  { %p2897_p5 = scmp.ne.s32.totalorder %s105_s30, %s2896_s29  ;;  %p2902_p7 = scmp.lt.s32.totalorder %s2896_s29, %s2896_s29 }
  0x54   :  { %p2903_p8 = por %p2902_p7, %p2901_p6 }
  0x56   :  { %p2904_p9 = pnand %p2903_p8, %p2897_p5 }
  0x58   :  { %2907 = shalt.err (!%p2904_p9)
}
  0x59   :  { %s4078_s23 = smov 4   ;;  %s4079_s28 = smov 64  }
  0x5a   :  { %110 = dma.hbm_to_vmem [thread:$0]  %s4077_s24, 1024, %s105_s30, [#allocation12], %s4079_s28, %s4079_s28, %s4078_s23  }
  0x5b   :  { %s2908_s19 = scalar_lea.hbm %s4035_s7, 1024 }
  0x5c   :  { %p2909_p10 = scmp.ne.s32.totalorder %s4035_s7, %s2908_s19  ;;  %p2912_p11 = scmp.lt.u32.totalorder %s2908_s19, %s4035_s7 }
  0x5e   :  { %p2914_p12 = pnand %p2912_p11, %p2909_p10 }
  0x60   :  { %2917 = shalt.err (!%p2914_p12)
}
  0x61   :  { %s2918_s5 = scalar_lea.vmem %s3525_s22, 1024  ;;  %p2923_p0 = scmp.lt.s32.totalorder %s3525_s22, %s3525_s22 }
  0x62   :  { %p2919_p13 = scmp.ne.s32.totalorder %s3525_s22, %s2918_s5  ;;  %p2924_p1 = scmp.lt.s32.totalorder %s2918_s5, %s2918_s5 }
  0x64   :  { %p2925_p2 = por %p2924_p1, %p2923_p0 }
  0x66   :  { %p2926_p3 = pnand %p2925_p2, %p2919_p13 }
  0x68   :  { %2929 = shalt.err (!%p2926_p3)
}
  0x69   :  { %134 = dma.hbm_to_vmem [thread:$0]  %s4035_s7, 1024, %s3525_s22, [#allocation15], %s4079_s28, %s4079_s28, %s4078_s23  }
  0x6a   :  { %s3360_s21 = smov [#allocation17]   ;;  %s3361_s29 = smov [#allocation20]  }
  0x6b   :  { %s152_s6 = sshll.u32 %s3360_s21, 4  ;;  %s176_s4 = sshll.u32 %s3361_s29, 4  ;;  %s153_s6 = int_to_ptr.vmem [resolvable:$true] %s152_s6  ;;  %s3562_s4 = int_to_ptr.vmem [resolvable:$true] %s176_s4 }
  0x6c   :  { %s2930_s27 = scalar_lea.hbm %s4037_s9, 1024 }
  0x6d   :  { %p2931_p4 = scmp.ne.s32.totalorder %s4037_s9, %s2930_s27  ;;  %p2934_p5 = scmp.lt.u32.totalorder %s2930_s27, %s4037_s9 }
  0x6f   :  { %p2936_p6 = pnand %p2934_p5, %p2931_p4 }
  0x71   :  { %2939 = shalt.err (!%p2936_p6)
}
  0x72   :  { %s2940_s7 = scalar_lea.vmem %s153_s6, 1024  ;;  %p2945_p8 = scmp.lt.s32.totalorder %s153_s6, %s153_s6 }
  0x73   :  { %p2941_p7 = scmp.ne.s32.totalorder %s153_s6, %s2940_s7  ;;  %p2946_p9 = scmp.lt.s32.totalorder %s2940_s7, %s2940_s7 }
  0x75   :  { %p2947_p10 = por %p2946_p9, %p2945_p8 }
  0x77   :  { %p2948_p11 = pnand %p2947_p10, %p2941_p7 }
  0x79   :  { %2951 = shalt.err (!%p2948_p11)
}
  0x7a   :  { %158 = dma.hbm_to_vmem [thread:$0]  %s4037_s9, 1024, %s153_s6, [#allocation18], %s4079_s28, %s4079_s28, %s4078_s23  }
  0x7b   :  { %s2952_s24 = scalar_lea.hbm %s4039_s11, 1024 }
  0x7c   :  { %p2953_p12 = scmp.ne.s32.totalorder %s4039_s11, %s2952_s24  ;;  %p2956_p13 = scmp.lt.u32.totalorder %s2952_s24, %s4039_s11 }
  0x7e   :  { %p2958_p0 = pnand %p2956_p13, %p2953_p12 }
  0x80   :  { %2961 = shalt.err (!%p2958_p0)
}
  0x81   :  { %s2962_s27 = scalar_lea.vmem %s3562_s4, 1024  ;;  %p2967_p2 = scmp.lt.s32.totalorder %s3562_s4, %s3562_s4 }
  0x82   :  { %p2963_p1 = scmp.ne.s32.totalorder %s3562_s4, %s2962_s27  ;;  %p2968_p3 = scmp.lt.s32.totalorder %s2962_s27, %s2962_s27 }
  0x84   :  { %p2969_p4 = por %p2968_p3, %p2967_p2 }
  0x86   :  { %p2970_p5 = pnand %p2969_p4, %p2963_p1 }
  0x88   :  { %2973 = shalt.err (!%p2970_p5)
}
  0x89   :  { %182 = dma.hbm_to_vmem [thread:$0]  %s4039_s11, 1024, %s3562_s4, [#allocation21], %s4079_s28, %s4079_s28, %s4078_s23  }
  0x8a   :  { %s3362_s19 = smov [#allocation2]   ;;  %s3363_s3 = smov [#allocation7]  }
  0x8b   :  { %s47_s26 = sshll.u32 %s3362_s19, 4  ;;  %s68_s0 = sshll.u32 %s3363_s3, 4  ;;  %s48_s26 = int_to_ptr.vmem [resolvable:$true] %s47_s26  ;;  %s3599_s0 = int_to_ptr.vmem [resolvable:$true] %s68_s0 }
  0x8c   :  { %s4080_s1 = sld [smem:[#allocation50_spill]] }
  0x92   :  { %s2974_s5 = scalar_lea.hbm %s4080_s1, 128 }
  0x93   :  { %p2975_p6 = scmp.ne.s32.totalorder %s4080_s1, %s2974_s5  ;;  %p2978_p7 = scmp.lt.u32.totalorder %s2974_s5, %s4080_s1 }
  0x95   :  { %p2980_p8 = pnand %p2978_p7, %p2975_p6 }
  0x97   :  { %2983 = shalt.err (!%p2980_p8)
}
  0x98   :  { %s2984_s11 = scalar_lea.vmem %s48_s26, 128  ;;  %p2989_p10 = scmp.lt.s32.totalorder %s48_s26, %s48_s26 }
  0x99   :  { %p2985_p9 = scmp.ne.s32.totalorder %s48_s26, %s2984_s11  ;;  %p2990_p11 = scmp.lt.s32.totalorder %s2984_s11, %s2984_s11 }
  0x9b   :  { %p2991_p12 = por %p2990_p11, %p2989_p10 }
  0x9d   :  { %p2992_p13 = pnand %p2991_p12, %p2985_p9 }
  0x9f   :  { %2995 = shalt.err (!%p2992_p13)
}
  0xa0   :  { %50 = dma.hbm_to_vmem [thread:$0]  %s4080_s1, 128, %s48_s26, [#allocation3]  }
  0xa1   :  { %s4081_s9 = sld [smem:[#allocation52_spill]] }
  0xa7   :  { %s2996_s6 = scalar_lea.hbm %s4081_s9, 1024 }
  0xa8   :  { %p2997_p0 = scmp.ne.s32.totalorder %s4081_s9, %s2996_s6  ;;  %p3000_p1 = scmp.lt.u32.totalorder %s2996_s6, %s4081_s9 }
  0xaa   :  { %p3002_p2 = pnand %p3000_p1, %p2997_p0 }
  0xac   :  { %3005 = shalt.err (!%p3002_p2)
}
  0xad   :  { %s3006_s5 = scalar_lea.vmem %s3599_s0, 1024  ;;  %p3011_p4 = scmp.lt.s32.totalorder %s3599_s0, %s3599_s0 }
  0xae   :  { %p3007_p3 = scmp.ne.s32.totalorder %s3599_s0, %s3006_s5  ;;  %p3012_p5 = scmp.lt.s32.totalorder %s3006_s5, %s3006_s5 }
  0xb0   :  { %p3013_p6 = por %p3012_p5, %p3011_p4 }
  0xb2   :  { %p3014_p7 = pnand %p3013_p6, %p3007_p3 }
  0xb4   :  { %3017 = shalt.err (!%p3014_p7)
}
  0xb5   :  { %74 = dma.hbm_to_vmem [thread:$0]  %s4081_s9, 1024, %s3599_s0, [#allocation6], %s4079_s28, %s4079_s28, %s4078_s23  }
  0xb6   :  { %s3364_s30 = smov [#allocation10]   ;;  %s3365_s21 = smov [#allocation13]  }
  0xb7   :  { %s92_s24 = sshll.u32 %s3364_s30, 4  ;;  %s116_s29 = sshll.u32 %s3365_s21, 4  ;;  %s93_s24 = int_to_ptr.vmem [resolvable:$true] %s92_s24  ;;  %s3633_s29 = int_to_ptr.vmem [resolvable:$true] %s116_s29 }
  0xb8   :  { %s4082_s2 = sld [smem:[#allocation54_spill]] }
  0xbe   :  { %s3018_s25 = scalar_lea.hbm %s4082_s2, 1024 }
  0xbf   :  { %p3019_p8 = scmp.ne.s32.totalorder %s4082_s2, %s3018_s25  ;;  %p3022_p9 = scmp.lt.u32.totalorder %s3018_s25, %s4082_s2 }
  0xc1   :  { %p3024_p10 = pnand %p3022_p9, %p3019_p8 }
  0xc3   :  { %3027 = shalt.err (!%p3024_p10)
}
  0xc4   :  { %s3028_s0 = scalar_lea.vmem %s93_s24, 1024  ;;  %p3033_p12 = scmp.lt.s32.totalorder %s93_s24, %s93_s24 }
  0xc5   :  { %p3029_p11 = scmp.ne.s32.totalorder %s93_s24, %s3028_s0  ;;  %p3034_p13 = scmp.lt.s32.totalorder %s3028_s0, %s3028_s0 }
  0xc7   :  { %p3035_p0 = por %p3034_p13, %p3033_p12 }
  0xc9   :  { %p3036_p1 = pnand %p3035_p0, %p3029_p11 }
  0xcb   :  { %3039 = shalt.err (!%p3036_p1)
}
  0xcc   :  { %98 = dma.hbm_to_vmem [thread:$0]  %s4082_s2, 1024, %s93_s24, [#allocation9], %s4079_s28, %s4079_s28, %s4078_s23  }
  0xcd   :  { %s4083_s26 = sld [smem:[#allocation56_spill]] }
  0xd3   :  { %s3040_s1 = scalar_lea.hbm %s4083_s26, 1024 }
  0xd4   :  { %p3041_p2 = scmp.ne.s32.totalorder %s4083_s26, %s3040_s1  ;;  %p3044_p3 = scmp.lt.u32.totalorder %s3040_s1, %s4083_s26 }
  0xd6   :  { %p3046_p4 = pnand %p3044_p3, %p3041_p2 }
  0xd8   :  { %3049 = shalt.err (!%p3046_p4)
}
  0xd9   :  { %s3050_s25 = scalar_lea.vmem %s3633_s29, 1024  ;;  %p3055_p6 = scmp.lt.s32.totalorder %s3633_s29, %s3633_s29 }
  0xda   :  { %p3051_p5 = scmp.ne.s32.totalorder %s3633_s29, %s3050_s25  ;;  %p3056_p7 = scmp.lt.s32.totalorder %s3050_s25, %s3050_s25 }
  0xdc   :  { %p3057_p8 = por %p3056_p7, %p3055_p6 }
  0xde   :  { %p3058_p9 = pnand %p3057_p8, %p3051_p5 }
  0xe0   :  { %3061 = shalt.err (!%p3058_p9)
}
  0xe1   :  { %122 = dma.hbm_to_vmem [thread:$0]  %s4083_s26, 1024, %s3633_s29, [#allocation12], %s4079_s28, %s4079_s28, %s4078_s23  }
  0xe2   :  { %s3366_s27 = smov [#allocation16]   ;;  %s3367_s19 = smov [#allocation19]  }
  0xe3   :  { %s140_s6 = sshll.u32 %s3366_s27, 4  ;;  %s164_s3 = sshll.u32 %s3367_s19, 4  ;;  %s141_s6 = int_to_ptr.vmem [resolvable:$true] %s140_s6  ;;  %s3670_s3 = int_to_ptr.vmem [resolvable:$true] %s164_s3 }
  0xe4   :  { %s3062_s7 = scalar_lea.hbm %s4036_s8, 1024 }
  0xe5   :  { %p3063_p10 = scmp.ne.s32.totalorder %s4036_s8, %s3062_s7  ;;  %p3066_p11 = scmp.lt.u32.totalorder %s3062_s7, %s4036_s8 }
  0xe7   :  { %p3068_p12 = pnand %p3066_p11, %p3063_p10 }
  0xe9   :  { %3071 = shalt.err (!%p3068_p12)
}
  0xea   :  { %s3072_s29 = scalar_lea.vmem %s141_s6, 1024  ;;  %p3077_p0 = scmp.lt.s32.totalorder %s141_s6, %s141_s6 }
  0xeb   :  { %p3073_p13 = scmp.ne.s32.totalorder %s141_s6, %s3072_s29  ;;  %p3078_p1 = scmp.lt.s32.totalorder %s3072_s29, %s3072_s29 }
  0xed   :  { %p3079_p2 = por %p3078_p1, %p3077_p0 }
  0xef   :  { %p3080_p3 = pnand %p3079_p2, %p3073_p13 }
  0xf1   :  { %3083 = shalt.err (!%p3080_p3)
}
  0xf2   :  { %146 = dma.hbm_to_vmem [thread:$0]  %s4036_s8, 1024, %s141_s6, [#allocation15], %s4079_s28, %s4079_s28, %s4078_s23  }
  0xf3   :  { %s3084_s25 = scalar_lea.hbm %s4038_s10, 2048 }
  0xf4   :  { %p3085_p4 = scmp.ne.s32.totalorder %s4038_s10, %s3084_s25  ;;  %p3088_p5 = scmp.lt.u32.totalorder %s3084_s25, %s4038_s10 }
  0xf6   :  { %p3090_p6 = pnand %p3088_p5, %p3085_p4 }
  0xf8   :  { %3093 = shalt.err (!%p3090_p6)
}
  0xf9   :  { %s3094_s0 = scalar_lea.vmem %s3670_s3, 2048  ;;  %p3099_p8 = scmp.lt.s32.totalorder %s3670_s3, %s3670_s3 }
  0xfa   :  { %p3095_p7 = scmp.ne.s32.totalorder %s3670_s3, %s3094_s0  ;;  %p3100_p9 = scmp.lt.s32.totalorder %s3094_s0, %s3094_s0 }
  0xfc   :  { %p3101_p10 = por %p3100_p9, %p3099_p8 }
  0xfe   :  { %p3102_p11 = pnand %p3101_p10, %p3095_p7 }
 0x100   :  { %3105 = shalt.err (!%p3102_p11)
}
 0x101   :  { %s3368_s8 = smov 128   ;;  %s3369_s6 = smov 8  }
 0x102   :  { %170 = dma.hbm_to_vmem [thread:$0]  %s4038_s10, 2048, %s3670_s3, [#allocation18], %s3368_s8, %s3368_s8, %s3369_s6  }
 0x103   :  { %s3370_s22 = smov [#allocation22]   ;;  %s3371_s1 = smov [#allocation23]  }
 0x104   :  { %s188_s5 = sshll.u32 %s3370_s22, 4  ;;  %s200_s30 = sshll.u32 %s3371_s1, 4  ;;  %s189_s5 = int_to_ptr.vmem [resolvable:$true] %s188_s5  ;;  %s3704_s30 = int_to_ptr.vmem [resolvable:$true] %s200_s30 }
 0x105   :  { %s3106_s21 = scalar_lea.hbm %s4040_s12, 1024 }
 0x106   :  { %p3107_p12 = scmp.ne.s32.totalorder %s4040_s12, %s3106_s21  ;;  %p3110_p13 = scmp.lt.u32.totalorder %s3106_s21, %s4040_s12 }
 0x108   :  { %p3112_p0 = pnand %p3110_p13, %p3107_p12 }
 0x10a   :  { %3115 = shalt.err (!%p3112_p0)
}
 0x10b   :  { %s3116_s10 = scalar_lea.vmem %s189_s5, 1024  ;;  %p3121_p2 = scmp.lt.s32.totalorder %s189_s5, %s189_s5 }
 0x10c   :  { %p3117_p1 = scmp.ne.s32.totalorder %s189_s5, %s3116_s10  ;;  %p3122_p3 = scmp.lt.s32.totalorder %s3116_s10, %s3116_s10 }
 0x10e   :  { %p3123_p4 = por %p3122_p3, %p3121_p2 }
 0x110   :  { %p3124_p5 = pnand %p3123_p4, %p3117_p1 }
 0x112   :  { %3127 = shalt.err (!%p3124_p5)
}
 0x113   :  { %194 = dma.hbm_to_vmem [thread:$0]  %s4040_s12, 1024, %s189_s5, [#allocation21], %s4079_s28, %s4079_s28, %s4078_s23  }
 0x114   :  { %s3128_s0 = scalar_lea.hbm %s4041_s13, 1024 }
 0x115   :  { %p3129_p6 = scmp.ne.s32.totalorder %s4041_s13, %s3128_s0  ;;  %p3132_p7 = scmp.lt.u32.totalorder %s3128_s0, %s4041_s13 }
 0x117   :  { %p3134_p8 = pnand %p3132_p7, %p3129_p6 }
 0x119   :  { %3137 = shalt.err (!%p3134_p8)
}
 0x11a   :  { %s3138_s22 = scalar_lea.vmem %s3704_s30, 1024  ;;  %p3143_p10 = scmp.lt.s32.totalorder %s3704_s30, %s3704_s30 }
 0x11b   :  { %p3139_p9 = scmp.ne.s32.totalorder %s3704_s30, %s3138_s22  ;;  %p3144_p11 = scmp.lt.s32.totalorder %s3138_s22, %s3138_s22 }
 0x11d   :  { %p3145_p12 = por %p3144_p11, %p3143_p10 }
 0x11f   :  { %p3146_p13 = pnand %p3145_p12, %p3139_p9 }
 0x121   :  { %3149 = shalt.err (!%p3146_p13)
}
 0x122   :  { %206 = dma.hbm_to_vmem [thread:$0]  %s4041_s13, 1024, %s3704_s30, [#allocation24], %s4079_s28, %s4079_s28, %s4078_s23  }
 0x123   :  { %3326 = dma.done.wait [#allocation3], 128  }
 0x124   :  { %3327 = vsyncadd [#allocation3], 4294967168 }
 0x125   :  { %3328 = dma.done.wait [#allocation6], 2048  }
 0x126   :  { %3329 = vsyncadd [#allocation6], 4294965248 }
 0x127   :  { %3330 = dma.done.wait [#allocation9], 4096  }
 0x128   :  { %3331 = vsyncadd [#allocation9], 4294963200 }
 0x129   :  { %3332 = dma.done.wait [#allocation12], 2048  }
 0x12a   :  { %3333 = vsyncadd [#allocation12], 4294965248 }
 0x12b   :  { %3334 = dma.done.wait [#allocation15], 2048  }
 0x12c   :  { %3335 = vsyncadd [#allocation15], 4294965248 }
 0x12d   :  { %3336 = dma.done.wait [#allocation18], 3072  }
 0x12e   :  { %3337 = vsyncadd [#allocation18], 4294964224 }
 0x12f   :  { %3338 = dma.done.wait [#allocation21], 2048  }
 0x130   :  { %3339 = vsyncadd [#allocation21], 4294965248 }
 0x131   :  { %3340 = dma.done.wait [#allocation24], 1024  }
 0x132   :  { %3341 = vsyncadd [#allocation24], 4294966272  ;;  %v3372_v0 = vmov 0.0   ;;  %vm3373_vm0 = vmmov 0   ;;  %v2690_v1 = vld [vmem:[#allocation5] sm:$0xff]   ;;  %v2691_v2 = vld [vmem:[#allocation5 + $0x8] sm:$0xff]  }
 0x133   :  { %2407 = vmatprep.subr.bf16.mxu0 %v3372_v0  ;;  %2423 = vmatprep.mubr.msk.bf16.mxu0 %vm3373_vm0, %v3372_v0  ;;  %v2692_v3 = vld [vmem:[#allocation5 + $0x10] sm:$0xff]   ;;  %v2698_v4 = vld [vmem:[#allocation7] sm:$0xff]   ;;  %v2693_v5 = vld [vmem:[#allocation5 + $0x18] sm:$0xff]   ;;  %v3374_v51 = vmov 0   ;;  %vm1501_vm1 = vcmask 1043456   ;;  %vm1484_vm2 = vcmask 64512  }
 0x134   :  { %2427 = vmatprep.subr.bf16.mxu1 %v3372_v0  ;;  %2443 = vmatprep.mubr.msk.bf16.mxu1 %vm3373_vm0, %v3372_v0  ;;  %v2699_v6 = vld [vmem:[#allocation7 + $0x8] sm:$0xff]   ;;  %v2694_v7 = vld [vmem:[#allocation5 + $0x20] sm:$0xff]   ;;  %v2700_v8 = vld [vmem:[#allocation7 + $0x10] sm:$0xff]   ;;  %s3375_s4 = smov [#allocation26]   ;;  %s3376_s24 = smov [#allocation29]  }
 0x135   :  { %2408 = vmatpush3.bf16.msra.mxu0 %v2690_v1  ;;  %2428 = vmatpush3.bf16.msra.mxu1 %v2698_v4  ;;  %v2695_v9 = vld [vmem:[#allocation5 + $0x28] sm:$0xff]   ;;  %v2701_v10 = vld [vmem:[#allocation7 + $0x18] sm:$0xff]   ;;  %v2696_v11 = vld [vmem:[#allocation5 + $0x30] sm:$0xff]   ;;  %s2047_s25 = sshll.u32 %s3375_s4, 4  ;;  %s2067_s10 = sshll.u32 %s3376_s24, 4  ;;  %s2048_s25 = int_to_ptr.vmem [resolvable:$true] %s2047_s25  ;;  %s2068_s10 = int_to_ptr.vmem [resolvable:$true] %s2067_s10 }
 0x136   :  { %2409 = vmatprep.subr.bf16.mxu0 %v3372_v0  ;;  %2429 = vmatprep.subr.bf16.mxu1 %v3372_v0  ;;  %v2702_v12 = vld [vmem:[#allocation7 + $0x20] sm:$0xff]   ;;  %v2697_v13 = vld [vmem:[#allocation5 + $0x38] sm:$0xff]   ;;  %v2703_v15 = vld [vmem:[#allocation7 + $0x28] sm:$0xff]   ;;  %s3150_s3 = scalar_lea.vmem %s2048_s25, 128  ;;  %p3155_p1 = scmp.lt.s32.totalorder %s2048_s25, %s2048_s25 }
 0x137   :  { %v252_v14 = vld [vmem:[#allocation2] sm:$0xff]  ;;  %v2704_v17 = vld [vmem:[#allocation7 + $0x30] sm:$0xff]   ;;  %v2706_v19 = vld [vmem:[#allocation8] ss:$12 sps:$4 sm:$0xff]   ;;  %p3151_p0 = scmp.ne.s32.totalorder %s2048_s25, %s3150_s3  ;;  %p3156_p2 = scmp.lt.s32.totalorder %s3150_s3, %s3150_s3 }
 0x138   :  { %v253_v16 = vpack.c.bf16 %v252_v14, %v252_v14  ;;  %v2705_v18 = vld [vmem:[#allocation7 + $0x38] sm:$0xff]   ;;  %v2708_v20 = vld [vmem:[#allocation8 + $0x4] ss:$12 sps:$4 sm:$0xff]   ;;  %v2716_v23 = vld [vmem:[#allocation8 + $0x34] ss:$12 sps:$4 sm:$0xff]  }
 0x139   :  { %2410 = vmatpush3.bf16.msra.mxu0 %v2691_v2  ;;  %2430 = vmatpush3.bf16.msra.mxu1 %v2699_v6  ;;  %v2712_v21 = vld [vmem:[#allocation8 + $0x1c] ss:$12 sps:$4 sm:$0xff]   ;;  %v2710_v22 = vld [vmem:[#allocation8 + $0x18] ss:$12 sps:$4 sm:$0xff]   ;;  %v2722_v28 = vld [vmem:[#allocation8 + $0x60] ss:$12 sps:$4 sm:$0xff]   ;;  %p3157_p3 = por %p3156_p2, %p3155_p1 }
 0x13a   :  { %2411 = vmatprep.subr.bf16.mxu0 %v3372_v0  ;;  %2431 = vmatprep.subr.bf16.mxu1 %v3372_v0  ;;  %v2714_v24 = vld [vmem:[#allocation8 + $0x30] ss:$12 sps:$4 sm:$0xff]   ;;  %v2720_v25 = vld [vmem:[#allocation8 + $0x4c] ss:$12 sps:$4 sm:$0xff]   ;;  %v2718_v26 = vld [vmem:[#allocation8 + $0x48] ss:$12 sps:$4 sm:$0xff]  }
 0x13b   :  { %v2724_v27 = vld [vmem:[#allocation8 + $0x64] ss:$12 sps:$4 sm:$0xff]   ;;  %v2728_v29 = vld [vmem:[#allocation8 + $0x7c] ss:$12 sps:$4 sm:$0xff]   ;;  %v2732_v31 = vld [vmem:[#allocation8 + $0x94] ss:$12 sps:$4 sm:$0xff]   ;;  %p3158_p4 = pnand %p3157_p3, %p3151_p0 }
 0x13c   :  { %v2726_v30 = vld [vmem:[#allocation8 + $0x78] ss:$12 sps:$4 sm:$0xff]   ;;  %v2730_v32 = vld [vmem:[#allocation8 + $0x90] ss:$12 sps:$4 sm:$0xff]   ;;  %v2148_v33 = vld [vmem:[%s4042_s14] ss:$0 sm:$0xff] }
 0x13d   :  { %2412 = vmatpush3.bf16.msra.mxu0 %v2692_v3  ;;  %2432 = vmatpush3.bf16.msra.mxu1 %v2700_v8  ;;  %v2709_v40 = vld [vmem:[#allocation8 + $0x8] ss:$12 sps:$4 sm:$0xff]   ;;  %v2713_v42 = vld [vmem:[#allocation8 + $0x20] ss:$12 sps:$4 sm:$0xff]   ;;  %v2717_v43 = vld [vmem:[#allocation8 + $0x38] ss:$12 sps:$4 sm:$0xff]  }
 0x13e   :  { %2413 = vmatprep.subr.bf16.mxu0 %v3372_v0  ;;  %2433 = vmatprep.subr.bf16.mxu1 %v3372_v0  ;;  %v2721_v44 = vld [vmem:[#allocation8 + $0x50] ss:$12 sps:$4 sm:$0xff]   ;;  %v2725_v45 = vld [vmem:[#allocation8 + $0x68] ss:$12 sps:$4 sm:$0xff]   ;;  %v2729_v46 = vld [vmem:[#allocation8 + $0x80] ss:$12 sps:$4 sm:$0xff]  }
 0x13f   :  { %v2733_v47 = vld [vmem:[#allocation8 + $0x98] ss:$12 sps:$4 sm:$0xff]   ;;  %v2734_v49 = vld [vmem:[#allocation8 + $0xa8] ss:$12 sps:$4 sm:$0xff]   ;;  %v2737_v50 = vld [vmem:[#allocation8 + $0xb0] ss:$12 sps:$4 sm:$0xff]  }
 0x140   :  { %v2736_v48 = vld [vmem:[#allocation8 + $0xac] ss:$12 sps:$4 sm:$0xff]   ;;  %v2157_v52 = vld [vmem:[%s4042_s14 + $0x1] ss:$0 sm:$0xff]  ;;  %v2740_v61 = vld [vmem:[#allocation10 + $0x10] sm:$0xff]  }
 0x141   :  { %2414 = vmatpush3.bf16.msra.mxu0 %v2693_v5  ;;  %2434 = vmatpush3.bf16.msra.mxu1 %v2701_v10  ;;  %v2738_v57 = vld [vmem:[#allocation10] sm:$0xff]   ;;  %v2739_v60 = vld [vmem:[#allocation10 + $0x8] sm:$0xff]   ;;  %v2741_v62 = vld [vmem:[#allocation10 + $0x18] sm:$0xff]  }
 0x142   :  { %2415 = vmatprep.subr.bf16.mxu0 %v3372_v0  ;;  %2435 = vmatprep.subr.bf16.mxu1 %v3372_v0  ;;  %v2742_v63 = vld [vmem:[#allocation10 + $0x20] sm:$0xff]   ;;  %v2743_v1 = vld [vmem:[#allocation10 + $0x28] sm:$0xff]   ;;  %v2744_v2 = vld [vmem:[#allocation10 + $0x30] sm:$0xff]  }
 0x143   :  { %v2745_v3 = vld [vmem:[#allocation10 + $0x38] sm:$0xff]   ;;  %v2762_v4 = vld [vmem:[#allocation11] sm:$0xff]   ;;  %v2763_v5 = vld [vmem:[#allocation11 + $0x8] sm:$0xff]  }
 0x144   :  { %v2764_v6 = vld [vmem:[#allocation11 + $0x10] sm:$0xff]   ;;  %v2766_v8 = vld [vmem:[#allocation11 + $0x20] sm:$0xff]  }
 0x145   :  { %2416 = vmatpush3.bf16.msra.mxu0 %v2694_v7  ;;  %2436 = vmatpush3.bf16.msra.mxu1 %v2702_v12  ;;  %v2765_v7 = vld [vmem:[#allocation11 + $0x18] sm:$0xff]   ;;  %v2190_v10 = vld [vmem:[%s4042_s14 + $0x2] ss:$0 sm:$0xff] }
 0x146   :  { %2417 = vmatprep.subr.bf16.mxu0 %v3372_v0  ;;  %2437 = vmatprep.subr.bf16.mxu1 %v3372_v0 }
 0x149   :  { %2418 = vmatpush3.bf16.msra.mxu0 %v2695_v9  ;;  %2438 = vmatpush3.bf16.msra.mxu1 %v2703_v15  ;;  %v2767_v9 = vld [vmem:[#allocation11 + $0x28] sm:$0xff]  }
 0x14a   :  { %2419 = vmatprep.subr.bf16.mxu0 %v3372_v0  ;;  %2439 = vmatprep.subr.bf16.mxu1 %v3372_v0 }
 0x14d   :  { %2420 = vmatpush3.bf16.msra.mxu0 %v2696_v11  ;;  %2440 = vmatpush3.bf16.msra.mxu1 %v2704_v17 }
 0x14e   :  { %2421 = vmatprep.subr.bf16.mxu0 %v3372_v0  ;;  %2441 = vmatprep.subr.bf16.mxu1 %v3372_v0 }
 0x151   :  { %2422 = vmatpush3.bf16.msra.mxu0 %v2697_v13  ;;  %2442 = vmatpush3.bf16.msra.mxu1 %v2705_v18 }
 0x152   :  { %2447 = vmatprep.subr.bf16.mxu1 %v3372_v0  ;;  %636 = vmatprep.subr.bf16.mxu0 %v2708_v20 }
 0x154   :  { %2424 = vmatmul.mubr.bf16.vlgmr.msra.gmra.mrb[0].mxu0 %v253_v16 }
 0x155   :  { %637 = vmatpush1.bf16.msra.mxu0 %v2706_v19  ;;  %668 = vmatprep.mubr.bf16.mxu0 %v3374_v51 }
 0x156   :  { %638 = vmatprep.subr.bf16.mxu0 %v2712_v21  ;;  %v2746_v21 = vld [vmem:[#allocation13] sm:$0xff]  }
 0x159   :  { %639 = vmatpush1.bf16.msra.mxu0 %v2710_v22 }
 0x15a   :  { %640 = vmatprep.subr.bf16.mxu0 %v2716_v23  ;;  %v2747_v23 = vld [vmem:[#allocation13 + $0x8] sm:$0xff]  }
 0x15d   :  { %641 = vmatpush1.bf16.msra.mxu0 %v2714_v24  ;;  %v2748_v24 = vld [vmem:[#allocation13 + $0x10] sm:$0xff]  }
 0x15e   :  { %642 = vmatprep.subr.bf16.mxu0 %v2720_v25  ;;  %v2749_v25 = vld [vmem:[#allocation13 + $0x18] sm:$0xff]  }
 0x161   :  { %643 = vmatpush1.bf16.msra.mxu0 %v2718_v26  ;;  %v2750_v26 = vld [vmem:[#allocation13 + $0x20] sm:$0xff]  }
 0x162   :  { %644 = vmatprep.subr.bf16.mxu0 %v2724_v27  ;;  %v2751_v27 = vld [vmem:[#allocation13 + $0x28] sm:$0xff]  }
 0x165   :  { %645 = vmatpush1.bf16.msra.mxu0 %v2722_v28  ;;  %v2191_v28 = vld [vmem:[%s4042_s14 + $0x3] ss:$0 sm:$0xff] }
 0x166   :  { %646 = vmatprep.subr.bf16.mxu0 %v2728_v29  ;;  %v2752_v29 = vld [vmem:[#allocation13 + $0x30] sm:$0xff]  }
 0x169   :  { %647 = vmatpush1.bf16.msra.mxu0 %v2726_v30 }
 0x16a   :  { %648 = vmatprep.subr.bf16.mxu0 %v2732_v31  ;;  %v2753_v31 = vld [vmem:[#allocation13 + $0x38] sm:$0xff]  }
 0x16d   :  { %649 = vmatpush1.bf16.msra.mxu0 %v2730_v32 }
 0x16e   :  { %650 = vmatprep.subr.bf16.mxu0 %v2736_v48  ;;  %v2193_v48 = vld [vmem:[%s4042_s14 + $0x5] ss:$0 sm:$0xff] }
 0x171   :  { %651 = vmatpush1.bf16.msra.mxu0 %v2734_v49 }
 0x172   :  { %2467 = vmatprep.subr.bf16.mxu0 %v3372_v0 }
 0x227   :  { %v357_v34 = vpop.f32.mrb[0].mxu0 }
 0x228   :  { %v358_v35 = vadd.f32 %v2148_v33, %v357_v34  ;;  %v2425_v36 = vpop.f32.mrb[1].mxu0  ;;  %v2754_v33 = vld [vmem:[#allocation16] sm:$0xff]  }
 0x229   :  { %v360_v37 = vpop.f32.mrb[2].mxu0  ;;  %v2756_v36 = vld [vmem:[#allocation16 + $0x10] sm:$0xff]  }
 0x22a   :  { %v363_v38 = vmax.f32 %v358_v35, 0.0  ;;  %v2426_v39 = vpop.f32.mrb[3].mxu0  ;;  %v2755_v35 = vld [vmem:[#allocation16 + $0x8] sm:$0xff]   ;;  %v2757_v37 = vld [vmem:[#allocation16 + $0x18] sm:$0xff]  }
 0x22b   :  { %v2759_v39 = vld [vmem:[#allocation16 + $0x28] sm:$0xff]  }
 0x22c   :  { %v364_v41 = vpack.c.bf16 %v363_v38, %v363_v38  ;;  %v2758_v38 = vld [vmem:[#allocation16 + $0x20] sm:$0xff]  }
 0x22e   :  { %2444 = vmatmul.mubr.bf16.vlgmr.msra.gmra.mrb[0].mxu1 %v364_v41  ;;  %v2760_v41 = vld [vmem:[#allocation16 + $0x30] sm:$0xff]  }
 0x22f   :  { %2448 = vmatpush3.bf16.msra.mxu1 %v2709_v40  ;;  %2463 = vmatprep.mubr.msk.bf16.mxu1 %vm3373_vm0, %v3372_v0  ;;  %v2192_v40 = vld [vmem:[%s4042_s14 + $0x4] ss:$0 sm:$0xff] }
 0x230   :  { %2449 = vmatprep.subr.bf16.mxu1 %v3372_v0 }
 0x233   :  { %2450 = vmatpush3.bf16.msra.mxu1 %v2713_v42 }
 0x234   :  { %2451 = vmatprep.subr.bf16.mxu1 %v3372_v0 }
 0x237   :  { %2452 = vmatpush3.bf16.msra.mxu1 %v2717_v43  ;;  %v2761_v43 = vld [vmem:[#allocation16 + $0x38] sm:$0xff]  }
 0x238   :  { %2453 = vmatprep.subr.bf16.mxu1 %v3372_v0 }
 0x23b   :  { %2454 = vmatpush3.bf16.msra.mxu1 %v2721_v44 }
 0x23c   :  { %2455 = vmatprep.subr.bf16.mxu1 %v3372_v0 }
 0x23f   :  { %2456 = vmatpush3.bf16.msra.mxu1 %v2725_v45 }
 0x240   :  { %2457 = vmatprep.subr.bf16.mxu1 %v3372_v0 }
 0x243   :  { %2458 = vmatpush3.bf16.msra.mxu1 %v2729_v46  ;;  %v2768_v46 = vld [vmem:[#allocation11 + $0x30] sm:$0xff]  }
 0x244   :  { %2459 = vmatprep.subr.bf16.mxu1 %v3372_v0 }
 0x247   :  { %2460 = vmatpush3.bf16.msra.mxu1 %v2733_v47  ;;  %v2769_v47 = vld [vmem:[#allocation11 + $0x38] sm:$0xff]  }
 0x248   :  { %2461 = vmatprep.subr.bf16.mxu1 %v3372_v0 }
 0x24b   :  { %2462 = vmatpush3.bf16.msra.mxu1 %v2737_v50 }
 0x24c   :  { %2487 = vmatprep.subr.bf16.mxu1 %v3372_v0 }
 0x301   :  { %v468_v53 = vpop.f32.mrb[0].mxu1 }
 0x302   :  { %v469_v54 = vadd.f32 %v2157_v52, %v468_v53  ;;  %v2445_v55 = vpop.f32.mrb[1].mxu1 }
 0x303   :  { %v471_v56 = vpop.f32.mrb[2].mxu1 }
 0x304   :  { %474 = vst [vmem:[#allocation31] sm:$0xff] %v469_v54  ;;  %v3780_v58 = vpack.c.bf16 %v469_v54, %v469_v54  ;;  %v2446_v59 = vpop.f32.mrb[3].mxu1 }
 0x306   :  { %669 = vmatmul.mubr.bf16.vlgmr.msra.gmra.mrb[4].mxu0 %v3780_v58  ;;  %2464 = vmatmul.mubr.bf16.vlgmr.msra.gmra.mrb[4].mxu1 %v3780_v58 }
 0x307   :  { %2468 = vmatpush3.bf16.msra.mxu0 %v2738_v57  ;;  %2483 = vmatprep.mubr.msk.bf16.mxu0 %vm3373_vm0, %v3372_v0  ;;  %v2211_v57 = vld [vmem:[%s4042_s14 + $0x7] ss:$0 sm:$0xff] }
 0x308   :  { %2469 = vmatprep.subr.bf16.mxu0 %v3372_v0  ;;  %2503 = vmatprep.mubr.msk.bf16.mxu1 %vm3373_vm0, %v3372_v0 }
 0x309   :  { %2488 = vmatpush3.bf16.msra.mxu1 %v2762_v4 }
 0x30a   :  { %2489 = vmatprep.subr.bf16.mxu1 %v3372_v0 }
 0x30b   :  { %2470 = vmatpush3.bf16.msra.mxu0 %v2739_v60 }
 0x30c   :  { %2471 = vmatprep.subr.bf16.mxu0 %v3372_v0 }
 0x30d   :  { %2490 = vmatpush3.bf16.msra.mxu1 %v2763_v5 }
 0x30e   :  { %2491 = vmatprep.subr.bf16.mxu1 %v3372_v0 }
 0x30f   :  { %2472 = vmatpush3.bf16.msra.mxu0 %v2740_v61 }
 0x310   :  { %2473 = vmatprep.subr.bf16.mxu0 %v3372_v0 }
 0x311   :  { %2492 = vmatpush3.bf16.msra.mxu1 %v2764_v6 }
 0x312   :  { %2493 = vmatprep.subr.bf16.mxu1 %v3372_v0 }
 0x313   :  { %2474 = vmatpush3.bf16.msra.mxu0 %v2741_v62 }
 0x314   :  { %2475 = vmatprep.subr.bf16.mxu0 %v3372_v0 }
 0x315   :  { %2494 = vmatpush3.bf16.msra.mxu1 %v2765_v7 }
 0x316   :  { %2495 = vmatprep.subr.bf16.mxu1 %v3372_v0 }
 0x317   :  { %2476 = vmatpush3.bf16.msra.mxu0 %v2742_v63 }
 0x318   :  { %2477 = vmatprep.subr.bf16.mxu0 %v3372_v0 }
 0x319   :  { %2496 = vmatpush3.bf16.msra.mxu1 %v2766_v8 }
 0x31a   :  { %2497 = vmatprep.subr.bf16.mxu1 %v3372_v0 }
 0x31b   :  { %2478 = vmatpush3.bf16.msra.mxu0 %v2743_v1 }
 0x31c   :  { %2479 = vmatprep.subr.bf16.mxu0 %v3372_v0 }
 0x31d   :  { %2498 = vmatpush3.bf16.msra.mxu1 %v2767_v9  ;;  %v2770_v9 = vld [vmem:[#allocation14] sm:$0xff]  }
 0x31e   :  { %2499 = vmatprep.subr.bf16.mxu1 %v3372_v0 }
 0x31f   :  { %2480 = vmatpush3.bf16.msra.mxu0 %v2744_v2  ;;  %v2231_v2 = vld [vmem:[%s4042_s14 + $0x9] ss:$0 sm:$0xff] }
 0x320   :  { %2481 = vmatprep.subr.bf16.mxu0 %v3372_v0 }
 0x321   :  { %2500 = vmatpush3.bf16.msra.mxu1 %v2768_v46  ;;  %v2781_v46 = vld [vmem:[#allocation17 + $0x18] sm:$0xff]  }
 0x322   :  { %2501 = vmatprep.subr.bf16.mxu1 %v3372_v0 }
 0x323   :  { %2482 = vmatpush3.bf16.msra.mxu0 %v2745_v3 }
 0x324   :  { %2507 = vmatprep.subr.bf16.mxu0 %v3372_v0 }
 0x325   :  { %2502 = vmatpush3.bf16.msra.mxu1 %v2769_v47 }
 0x326   :  { %2527 = vmatprep.subr.bf16.mxu1 %v3372_v0 }
 0x3d9   :  { %v670_v11 = vpop.f32.mrb[4].mxu0  ;;  %v711_v12 = vpop.f32.mrb[4].mxu1 }
 0x3da   :  { %v722_v13 = vadd.f32 %v2190_v10, %v670_v11  ;;  %v672_v14 = vpop.f32.mrb[5].mxu0  ;;  %v2465_v15 = vpop.f32.mrb[5].mxu1  ;;  %v736_v42 = vadd.f32 %v2192_v40, %v711_v12  ;;  %v2771_v10 = vld [vmem:[#allocation14 + $0x8] sm:$0xff]   ;;  %v2772_v11 = vld [vmem:[#allocation14 + $0x10] sm:$0xff]   ;;  %v2778_v40 = vld [vmem:[#allocation17] sm:$0xff]  }
 0x3db   :  { %v674_v16 = vpop.f32.mrb[6].mxu0  ;;  %v714_v17 = vpop.f32.mrb[6].mxu1  ;;  %v729_v30 = vadd.f32 %v2191_v28, %v672_v14 }
 0x3dc   :  { %v723_v18 = vmax.f32 %v722_v13, 0.0  ;;  %v675_v19 = vpop.f32.mrb[7].mxu0  ;;  %v2466_v20 = vpop.f32.mrb[7].mxu1  ;;  %v737_v44 = vmax.f32 %v736_v42, 0.0  ;;  %v2773_v16 = vld [vmem:[#allocation14 + $0x18] sm:$0xff]   ;;  %v2774_v17 = vld [vmem:[#allocation14 + $0x20] sm:$0xff]  }
 0x3dd   :  { %v730_v32 = vmax.f32 %v729_v30, 0.0  ;;  %v2776_v20 = vld [vmem:[#allocation14 + $0x30] sm:$0xff]   ;;  %v2779_v42 = vld [vmem:[#allocation17 + $0x8] sm:$0xff]  }
 0x3de   :  { %v738_v22 = vpack.c.bf16 %v723_v18, %v723_v18  ;;  %v1206_v45 = vpack.c.bf16 %v737_v44, %v737_v44  ;;  %v2775_v18 = vld [vmem:[#allocation14 + $0x28] sm:$0xff]  }
 0x3df   :  { %v962_v34 = vpack.c.bf16 %v730_v32, %v730_v32 }
 0x3e0   :  { %2484 = vmatmul.mubr.bf16.vlgmr.msra.gmra.mrb[8].mxu0 %v738_v22 }
 0x3e1   :  { %2508 = vmatpush3.bf16.msra.mxu0 %v2746_v21  ;;  %2523 = vmatprep.mubr.msk.bf16.mxu0 %vm3373_vm0, %v3372_v0 }
 0x3e2   :  { %2509 = vmatprep.subr.bf16.mxu0 %v3372_v0 }
 0x3e5   :  { %2510 = vmatpush3.bf16.msra.mxu0 %v2747_v23  ;;  %v2777_v23 = vld [vmem:[#allocation14 + $0x38] sm:$0xff]  }
 0x3e6   :  { %2511 = vmatprep.subr.bf16.mxu0 %v3372_v0 }
 0x3e9   :  { %2512 = vmatpush3.bf16.msra.mxu0 %v2748_v24 }
 0x3ea   :  { %2513 = vmatprep.subr.bf16.mxu0 %v3372_v0 }
 0x3ed   :  { %2514 = vmatpush3.bf16.msra.mxu0 %v2749_v25  ;;  %v2202_v25 = vld [vmem:[%s4042_s14 + $0x6] ss:$0 sm:$0xff] }
 0x3ee   :  { %2515 = vmatprep.subr.bf16.mxu0 %v3372_v0 }
 0x3f1   :  { %2516 = vmatpush3.bf16.msra.mxu0 %v2750_v26 }
 0x3f2   :  { %2517 = vmatprep.subr.bf16.mxu0 %v3372_v0 }
 0x3f5   :  { %2518 = vmatpush3.bf16.msra.mxu0 %v2751_v27 }
 0x3f6   :  { %2519 = vmatprep.subr.bf16.mxu0 %v3372_v0 }
 0x3f9   :  { %2520 = vmatpush3.bf16.msra.mxu0 %v2752_v29 }
 0x3fa   :  { %2521 = vmatprep.subr.bf16.mxu0 %v3372_v0 }
 0x3fd   :  { %2522 = vmatpush3.bf16.msra.mxu0 %v2753_v31 }
 0x3fe   :  { %2547 = vmatprep.subr.bf16.mxu0 %v3372_v0 }
 0x400   :  { %2524 = vmatmul.mubr.bf16.vlgmr.msra.gmra.mrb[12].mxu0 %v962_v34 }
 0x401   :  { %2548 = vmatpush3.bf16.msra.mxu0 %v2754_v33  ;;  %2563 = vmatprep.mubr.msk.bf16.mxu0 %vm3373_vm0, %v3372_v0 }
 0x402   :  { %2549 = vmatprep.subr.bf16.mxu0 %v3372_v0 }
 0x405   :  { %2550 = vmatpush3.bf16.msra.mxu0 %v2755_v35  ;;  %v2220_v35 = vld [vmem:[%s4042_s14 + $0xb] ss:$0 sm:$0xff] }
 0x406   :  { %2551 = vmatprep.subr.bf16.mxu0 %v3372_v0 }
 0x409   :  { %2552 = vmatpush3.bf16.msra.mxu0 %v2756_v36 }
 0x40a   :  { %2553 = vmatprep.subr.bf16.mxu0 %v3372_v0 }
 0x40d   :  { %2554 = vmatpush3.bf16.msra.mxu0 %v2757_v37  ;;  %v2221_v37 = vld [vmem:[%s4042_s14 + $0xc] ss:$0 sm:$0xff] }
 0x40e   :  { %2555 = vmatprep.subr.bf16.mxu0 %v3372_v0 }
 0x411   :  { %2556 = vmatpush3.bf16.msra.mxu0 %v2758_v38 }
 0x412   :  { %2557 = vmatprep.subr.bf16.mxu0 %v3372_v0 }
 0x415   :  { %2558 = vmatpush3.bf16.msra.mxu0 %v2759_v39 }
 0x416   :  { %2559 = vmatprep.subr.bf16.mxu0 %v3372_v0 }
 0x419   :  { %2560 = vmatpush3.bf16.msra.mxu0 %v2760_v41 }
 0x41a   :  { %2561 = vmatprep.subr.bf16.mxu0 %v3372_v0 }
 0x41d   :  { %2562 = vmatpush3.bf16.msra.mxu0 %v2761_v43  ;;  %v2780_v43 = vld [vmem:[#allocation17 + $0x10] sm:$0xff]  }
 0x41e   :  { %2587 = vmatprep.subr.bf16.mxu0 %v3372_v0 }
 0x420   :  { %2564 = vmatmul.mubr.bf16.vlgmr.msra.gmra.mrb[16].mxu0 %v1206_v45 }
 0x421   :  { %2589 = vmatprep.mubr.msk.bf16.mxu0 %vm3373_vm0, %v3372_v0 }
 0x4b3   :  { %v842_v49 = vpop.f32.mrb[8].mxu0 }
 0x4b4   :  { %v843_v50 = vadd.f32 %v2193_v48, %v842_v49  ;;  %v2485_v52 = vpop.f32.mrb[9].mxu0  ;;  %v2782_v48 = vld [vmem:[#allocation17 + $0x20] sm:$0xff]   ;;  %v2783_v49 = vld [vmem:[#allocation17 + $0x28] sm:$0xff]  }
 0x4b5   :  { %v845_v53 = vpop.f32.mrb[10].mxu0 }
 0x4b6   :  { %v848_v54 = vmax.f32 %v843_v50, 0.0  ;;  %v2486_v55 = vpop.f32.mrb[11].mxu0  ;;  %v2784_v50 = vld [vmem:[#allocation17 + $0x30] sm:$0xff]  }
 0x4b8   :  { %v849_v56 = vpack.c.bf16 %v848_v54, %v848_v54  ;;  %v2785_v54 = vld [vmem:[#allocation17 + $0x38] sm:$0xff]  }
 0x4ba   :  { %2504 = vmatmul.mubr.bf16.vlgmr.msra.gmra.mrb[8].mxu1 %v849_v56 }
 0x4bb   :  { %2543 = vmatprep.mubr.msk.bf16.mxu1 %vm3373_vm0, %v3372_v0  ;;  %2528 = vmatpush3.bf16.msra.mxu1 %v2770_v9 }
 0x4bc   :  { %2529 = vmatprep.subr.bf16.mxu1 %v3372_v0 }
 0x4bf   :  { %2530 = vmatpush3.bf16.msra.mxu1 %v2771_v10 }
 0x4c0   :  { %2531 = vmatprep.subr.bf16.mxu1 %v3372_v0 }
 0x4c3   :  { %2532 = vmatpush3.bf16.msra.mxu1 %v2772_v11 }
 0x4c4   :  { %2533 = vmatprep.subr.bf16.mxu1 %v3372_v0 }
 0x4c7   :  { %2534 = vmatpush3.bf16.msra.mxu1 %v2773_v16 }
 0x4c8   :  { %2535 = vmatprep.subr.bf16.mxu1 %v3372_v0 }
 0x4cb   :  { %2536 = vmatpush3.bf16.msra.mxu1 %v2774_v17 }
 0x4cc   :  { %2537 = vmatprep.subr.bf16.mxu1 %v3372_v0 }
 0x4cf   :  { %2538 = vmatpush3.bf16.msra.mxu1 %v2775_v18 }
 0x4d0   :  { %2539 = vmatprep.subr.bf16.mxu1 %v3372_v0 }
 0x4d3   :  { %v1066_v59 = vpop.f32.mrb[12].mxu0  ;;  %2540 = vmatpush3.bf16.msra.mxu1 %v2776_v20 }
 0x4d4   :  { %v1067_v60 = vadd.f32 %v2211_v57, %v1066_v59  ;;  %v2525_v61 = vpop.f32.mrb[13].mxu0  ;;  %2541 = vmatprep.subr.bf16.mxu1 %v3372_v0  ;;  %v1503_v59 = vsel %vm1501_vm1, %v3780_v58, 0  ;;  %v2240_v58 = vld [vmem:[%s4042_s14 + $0xa] ss:$0 sm:$0xff] }
 0x4d5   :  { %v1069_v62 = vpop.f32.mrb[14].mxu0 }
 0x4d6   :  { %v1072_v63 = vmax.f32 %v1067_v60, 0.0  ;;  %v2526_v1 = vpop.f32.mrb[15].mxu0  ;;  %v2222_v60 = vld [vmem:[%s4042_s14 + $0x8] ss:$0 sm:$0xff] }
 0x4d7   :  { %2542 = vmatpush3.bf16.msra.mxu1 %v2777_v23  ;;  %v2789_v23 = vld [vmem:[#allocation19 + $0x10] ss:$8 sps:$4 sm:$0xff]  }
 0x4d8   :  { %1073 = vadd.xlane.f32.xlu0 %v1072_v63  ;;  %2567 = vmatprep.subr.bf16.mxu1 %v3372_v0 }
 0x4f3   :  { %v1310_v3 = vpop.f32.mrb[16].mxu0 }
 0x4f4   :  { %v1311_v4 = vadd.f32 %v2231_v2, %v1310_v3  ;;  %v2565_v5 = vpop.f32.mrb[17].mxu0 }
 0x4f5   :  { %v1313_v6 = vpop.f32.mrb[18].mxu0 }
 0x4f6   :  { %v1316_v7 = vmax.f32 %v1311_v4, 0.0  ;;  %v2566_v8 = vpop.f32.mrb[19].mxu0 }
 0x4f8   :  { %1317 = vadd.xlane.f32.xlu0 %v1316_v7 }
 0x565   :  { %v1074_v12 = vpop.xlane.xlu0 %1073 }
 0x566   :  { %v1076_v13 = vmul.f32 0.0078125, %v1074_v12 }
 0x568   :  { %v1077_v14 = vsub.f32 %v1072_v63, %v1076_v13 }
 0x56a   :  { %v1078_v15 = vmul.f32 %v1077_v14, %v1077_v14 }
 0x56c   :  { %1079 = vadd.xlane.f32.xlu1 %v1078_v15 }
 0x585   :  { %v1318_v19 = vpop.xlane.xlu0 %1317 }
 0x586   :  { %v1319_v21 = vmul.f32 0.0078125, %v1318_v19 }
 0x588   :  { %v1320_v22 = vsub.f32 %v1316_v7, %v1319_v21  ;;  %v2788_v21 = vld [vmem:[#allocation19 + $0x4] ss:$8 sps:$4 sm:$0xff]  }
 0x58a   :  { %v1321_v24 = vmul.f32 %v1320_v22, %v1320_v22 }
 0x58c   :  { %1322 = vadd.xlane.f32.xlu1 %v1321_v24  ;;  %v2794_v24 = vld [vmem:[#allocation19 + $0x24] ss:$8 sps:$4 sm:$0xff]  }
 0x58d   :  { %v953_v26 = vpop.f32.mrb[8].mxu1 }
 0x58e   :  { %v954_v27 = vadd.f32 %v2202_v25, %v953_v26  ;;  %v2505_v28 = vpop.f32.mrb[9].mxu1  ;;  %v2792_v25 = vld [vmem:[#allocation19 + $0x20] ss:$8 sps:$4 sm:$0xff]   ;;  %v2797_v26 = vld [vmem:[#allocation19 + $0x34] ss:$8 sps:$4 sm:$0xff]  }
 0x58f   :  { %v956_v29 = vpop.f32.mrb[10].mxu1  ;;  %v2800_v28 = vld [vmem:[#allocation19 + $0x44] ss:$8 sps:$4 sm:$0xff]  }
 0x590   :  { %959 = vst [vmem:[#allocation34] sm:$0xff] %v954_v27  ;;  %v2506_v30 = vpop.f32.mrb[11].mxu1  ;;  %v2795_v27 = vld [vmem:[#allocation19 + $0x30] ss:$8 sps:$4 sm:$0xff]   ;;  %v2798_v29 = vld [vmem:[#allocation19 + $0x40] ss:$8 sps:$4 sm:$0xff]  }
 0x591   :  { %v2803_v30 = vld [vmem:[#allocation19 + $0x54] ss:$8 sps:$4 sm:$0xff]  }
 0x5f9   :  { %v1080_v31 = vpop.xlane.xlu1 %1079 }
 0x5fa   :  { %v1081_v32 = vmul.f32 0.0078125, %v1080_v31  ;;  %v2801_v31 = vld [vmem:[#allocation19 + $0x50] ss:$8 sps:$4 sm:$0xff]  }
 0x5fc   :  { %v1082_v33 = vadd.f32 1e-05, %v1081_v32  ;;  %v2806_v32 = vld [vmem:[#allocation19 + $0x64] ss:$8 sps:$4 sm:$0xff]  }
 0x5fe   :  { %2834 = vrsqrt.f32 %v1082_v33  ;;  %v2804_v33 = vld [vmem:[#allocation19 + $0x60] ss:$8 sps:$4 sm:$0xff]  }
 0x608   :  { %v2835_v34 = vpop.eup %2834 }
 0x609   :  { %v1084_v36 = vmul.f32 %v2835_v34, %v1077_v14  ;;  %v2809_v34 = vld [vmem:[#allocation19 + $0x74] ss:$8 sps:$4 sm:$0xff]  }
 0x60b   :  { %v1089_v38 = vmul.f32 %v2220_v35, %v1084_v36 }
 0x60d   :  { %v1094_v39 = vadd.f32 %v2221_v37, %v1089_v38 }
 0x60f   :  { %v1095_v41 = vpack.c.bf16 %v1094_v39, %v1094_v39 }
 0x611   :  { %2544 = vmatmul.mubr.bf16.vlgmr.msra.gmra.mrb[12].mxu1 %v1095_v41  ;;  %v2811_v41 = vld [vmem:[#allocation20 + $0x8] sm:$0xff]  }
 0x612   :  { %2568 = vmatpush3.bf16.msra.mxu1 %v2778_v40  ;;  %2583 = vmatprep.mubr.msk.bf16.mxu1 %vm3373_vm0, %v3372_v0  ;;  %v2810_v40 = vld [vmem:[#allocation20] sm:$0xff]  }
 0x613   :  { %2569 = vmatprep.subr.bf16.mxu1 %v3372_v0 }
 0x616   :  { %2570 = vmatpush3.bf16.msra.mxu1 %v2779_v42  ;;  %v2812_v42 = vld [vmem:[#allocation20 + $0x10] sm:$0xff]  }
 0x617   :  { %2571 = vmatprep.subr.bf16.mxu1 %v3372_v0 }
 0x619   :  { %v1323_v44 = vpop.xlane.xlu1 %1322 }
 0x61a   :  { %2572 = vmatpush3.bf16.msra.mxu1 %v2780_v43  ;;  %v1324_v45 = vmul.f32 0.0078125, %v1323_v44  ;;  %v2813_v43 = vld [vmem:[#allocation20 + $0x18] sm:$0xff]   ;;  %v2814_v44 = vld [vmem:[#allocation20 + $0x20] sm:$0xff]  }
 0x61b   :  { %2573 = vmatprep.subr.bf16.mxu1 %v3372_v0 }
 0x61c   :  { %v1325_v47 = vadd.f32 1e-05, %v1324_v45  ;;  %v2815_v45 = vld [vmem:[#allocation20 + $0x28] sm:$0xff]  }
 0x61e   :  { %2836 = vrsqrt.f32 %v1325_v47  ;;  %2574 = vmatpush3.bf16.msra.mxu1 %v2781_v46  ;;  %v2816_v46 = vld [vmem:[#allocation20 + $0x30] sm:$0xff]  }
 0x61f   :  { %2575 = vmatprep.subr.bf16.mxu1 %v3372_v0 }
 0x622   :  { %2576 = vmatpush3.bf16.msra.mxu1 %v2782_v48 }
 0x623   :  { %2577 = vmatprep.subr.bf16.mxu1 %v3372_v0 }
 0x626   :  { %2578 = vmatpush3.bf16.msra.mxu1 %v2783_v49 }
 0x627   :  { %2579 = vmatprep.subr.bf16.mxu1 %v3372_v0 }
 0x628   :  { %v2837_v52 = vpop.eup %2836 }
 0x629   :  { %v1327_v53 = vmul.f32 %v2837_v52, %v1320_v22  ;;  %v2791_v22 = vld [vmem:[#allocation19 + $0x14] ss:$8 sps:$4 sm:$0xff]  }
 0x62a   :  { %2580 = vmatpush3.bf16.msra.mxu1 %v2784_v50 }
 0x62b   :  { %2581 = vmatprep.subr.bf16.mxu1 %v3372_v0  ;;  %v1328_v55 = vmul.f32 %v2220_v35, %v1327_v53  ;;  %v2807_v35 = vld [vmem:[#allocation19 + $0x70] ss:$8 sps:$4 sm:$0xff]  }
 0x62c   :  { %v2817_v53 = vld [vmem:[#allocation20 + $0x38] sm:$0xff]  }
 0x62d   :  { %v1329_v56 = vadd.f32 %v2221_v37, %v1328_v55  ;;  %v2827_v55 = vld [vmem:[#allocation22 + $0x8] sm:$0xff]  }
 0x62e   :  { %2582 = vmatpush3.bf16.msra.mxu1 %v2785_v54  ;;  %v2826_v54 = vld [vmem:[#allocation22] sm:$0xff]  }
 0x62f   :  { %2593 = vmatprep.subr.bf16.mxu1 %v3372_v0  ;;  %v1330_v57 = vpack.c.bf16 %v1329_v56, %v1329_v56  ;;  %v2828_v56 = vld [vmem:[#allocation22 + $0x10] sm:$0xff]  }
 0x631   :  { %2584 = vmatmul.mubr.bf16.vlgmr.msra.gmra.mrb[16].mxu1 %v1330_v57  ;;  %v2829_v57 = vld [vmem:[#allocation22 + $0x18] sm:$0xff]  }
 0x632   :  { %2594 = vmatpush3.bf16.msra.mxu1 %v1503_v59  ;;  %2595 = vmatprep.mubr.msk.bf16.mxu1 %vm3373_vm0, %v3372_v0  ;;  %v2830_v59 = vld [vmem:[#allocation22 + $0x20] sm:$0xff]  }
 0x633   :  { %2599 = vmatprep.subr.bf16.mxu1 %v3372_v0 }
 0x6e4   :  { %v1199_v61 = vpop.f32.mrb[12].mxu1 }
 0x6e5   :  { %v1200_v62 = vadd.f32 %v2222_v60, %v1199_v61  ;;  %v2545_v63 = vpop.f32.mrb[13].mxu1  ;;  %v2831_v60 = vld [vmem:[#allocation22 + $0x28] sm:$0xff]  }
 0x6e6   :  { %v1202_v1 = vpop.f32.mrb[14].mxu1  ;;  %v2266_v61 = vld [vmem:[%s4042_s14 + $0xd] ss:$0 sm:$0xff] }
 0x6e7   :  { %v1442_v2 = vpack.c.bf16 %v1200_v62, %v1200_v62  ;;  %1205 = vst [vmem:[#allocation26] sm:$0xff] %v1200_v62  ;;  %v2546_v3 = vpop.f32.mrb[15].mxu1 }
 0x6e9   :  { %2588 = vmatpush3.bf16.xpose.msra.mxu0 %v1442_v2 }
 0x6ea   :  { %1643 = vmatprep.subr.bf16.mxu0 %v2788_v21 }
 0x704   :  { %v1434_v4 = vpop.f32.mrb[16].mxu1 }
 0x705   :  { %v1435_v5 = vadd.f32 %v2240_v58, %v1434_v4  ;;  %v2585_v6 = vpop.f32.mrb[17].mxu1  ;;  %v2818_v4 = vld [vmem:[#allocation23] sm:$0xff]  }
 0x706   :  { %v1437_v7 = vpop.f32.mrb[18].mxu1  ;;  %v2819_v6 = vld [vmem:[#allocation23 + $0x8] sm:$0xff]  }
 0x707   :  { %1440 = vst [vmem:[#allocation28] sm:$0xff] %v1435_v5  ;;  %v1441_v8 = vpack.c.bf16 %v1435_v5, %v1435_v5  ;;  %v2586_v9 = vpop.f32.mrb[19].mxu1  ;;  %v2820_v7 = vld [vmem:[#allocation23 + $0x10] sm:$0xff]  }
 0x708   :  { %v2822_v9 = vld [vmem:[#allocation23 + $0x20] sm:$0xff]  }
 0x709   :  { %2590 = vmatmul.mubr.bf16.vlgmr.msra.gmra.mrb[20].mxu0 %v1441_v8  ;;  %v2821_v8 = vld [vmem:[#allocation23 + $0x18] sm:$0xff]  }
 0x70a   :  { %1675 = vmatprep.mubr.bf16.mxu0 %v3374_v51  ;;  %v2786_v51 = vld [vmem:[#allocation19] ss:$8 sps:$4 sm:$0xff]  }
 0x70b   :  { %1644 = vmatpush1.bf16.msra.mxu0 %v2786_v51 }
 0x70c   :  { %1645 = vmatprep.subr.bf16.mxu0 %v2791_v22 }
 0x70f   :  { %1646 = vmatpush1.bf16.msra.mxu0 %v2789_v23 }
 0x710   :  { %1647 = vmatprep.subr.bf16.mxu0 %v2794_v24 }
 0x713   :  { %1648 = vmatpush1.bf16.msra.mxu0 %v2792_v25 }
 0x714   :  { %1649 = vmatprep.subr.bf16.mxu0 %v2797_v26  ;;  %v2286_v26 = vld [vmem:[%s4042_s14 + $0x11] ss:$0 sm:$0xff] }
 0x717   :  { %1650 = vmatpush1.bf16.msra.mxu0 %v2795_v27 }
 0x718   :  { %1651 = vmatprep.subr.bf16.mxu0 %v2800_v28 }
 0x71b   :  { %1652 = vmatpush1.bf16.msra.mxu0 %v2798_v29 }
 0x71c   :  { %1653 = vmatprep.subr.bf16.mxu0 %v2803_v30 }
 0x71f   :  { %1654 = vmatpush1.bf16.msra.mxu0 %v2801_v31 }
 0x720   :  { %1655 = vmatprep.subr.bf16.mxu0 %v2806_v32 }
 0x723   :  { %1656 = vmatpush1.bf16.msra.mxu0 %v2804_v33 }
 0x724   :  { %1657 = vmatprep.subr.bf16.mxu0 %v2809_v34 }
 0x727   :  { %1658 = vmatpush1.bf16.msra.mxu0 %v2807_v35 }
 0x728   :  { %2619 = vmatprep.subr.bf16.mxu0 %v3372_v0 }
 0x7dc   :  { %v1477_v10 = vpop.f32.mrb[20].mxu0 }
 0x7dd   :  { %v1483_v11 = vmul.f32 0.088388346, %v1477_v10  ;;  %v2591_v12 = vpop.f32.mrb[21].mxu0  ;;  %v2823_v10 = vld [vmem:[#allocation23 + $0x28] sm:$0xff]  }
 0x7de   :  { %v1480_v13 = vpop.f32.mrb[22].mxu0  ;;  %v2824_v12 = vld [vmem:[#allocation23 + $0x30] sm:$0xff]  }
 0x7df   :  { %v2592_v14 = vpop.f32.mrb[23].mxu0  ;;  %v1486_v15 = vsel %vm1484_vm2, %v1483_v11, -inf  ;;  %1485 = vst.msk [vmem:[#allocation29] sm:$0xff] %vm1484_vm2, %v1483_v11 }
 0x7e0   :  { %1487 = vmax.xlane.f32.xlu0 %v1486_v15  ;;  %v2825_v14 = vld [vmem:[#allocation23 + $0x38] sm:$0xff]  }
 0x86d   :  { %v1488_v16 = vpop.xlane.xlu0 %1487 }
 0x86e   :  { %v1489_v17 = vsub.f32 %v1483_v11, %v1488_v16  ;;  %v2267_v11 = vld [vmem:[%s4042_s14 + $0xe] ss:$0 sm:$0xff] }
 0x870   :  { %v1490_v18 = vmul.f32 1.442695, %v1489_v17  ;;  %v2832_v17 = vld [vmem:[#allocation22 + $0x30] sm:$0xff]  }
 0x872   :  { %2838 = vpow2.f32 %v1490_v18  ;;  %v2833_v18 = vld [vmem:[#allocation22 + $0x38] sm:$0xff]  }
 0x87c   :  { %v2839_v19 = vpop.eup %2838 }
 0x87d   :  { %v1492_v20 = vsel %vm1484_vm2, %v2839_v19, 0.0 }
 0x87e   :  { %1493 = vadd.xlane.f32.xlu1 %v1492_v20 }
 0x90b   :  { %v1494_v36 = vpop.xlane.xlu1 %1493 }
 0x90c   :  { %2840 = vrcp.f32 %v1494_v36 }
 0x916   :  { %v2841_v37 = vpop.eup %2840 }
 0x917   :  { %v1496_v38 = vmul.f32 %v2841_v37, %v2839_v19  ;;  %v2268_v19 = vld [vmem:[%s4042_s14 + $0xf] ss:$0 sm:$0xff] }
 0x919   :  { %v1497_v39 = vpack.c.bf16 %v1496_v38, %v1496_v38 }
 0x91b   :  { %2596 = vmatmul.mubr.msk.bf16.vlgmr.msra.gmra.mrb[20].mxu1 %vm1484_vm2, %v1497_v39 }
 0x91c   :  { %2615 = vmatprep.mubr.msk.bf16.mxu1 %vm3373_vm0, %v3372_v0  ;;  %2600 = vmatpush3.bf16.msra.mxu1 %v2810_v40 }
 0x91d   :  { %2601 = vmatprep.subr.bf16.mxu1 %v3372_v0 }
 0x920   :  { %2602 = vmatpush3.bf16.msra.mxu1 %v2811_v41 }
 0x921   :  { %2603 = vmatprep.subr.bf16.mxu1 %v3372_v0 }
 0x924   :  { %2604 = vmatpush3.bf16.msra.mxu1 %v2812_v42 }
 0x925   :  { %2605 = vmatprep.subr.bf16.mxu1 %v3372_v0 }
 0x928   :  { %2606 = vmatpush3.bf16.msra.mxu1 %v2813_v43 }
 0x929   :  { %2607 = vmatprep.subr.bf16.mxu1 %v3372_v0 }
 0x92c   :  { %2608 = vmatpush3.bf16.msra.mxu1 %v2814_v44 }
 0x92d   :  { %2609 = vmatprep.subr.bf16.mxu1 %v3372_v0 }
 0x930   :  { %2610 = vmatpush3.bf16.msra.mxu1 %v2815_v45 }
 0x931   :  { %2611 = vmatprep.subr.bf16.mxu1 %v3372_v0 }
 0x934   :  { %2612 = vmatpush3.bf16.msra.mxu1 %v2816_v46 }
 0x935   :  { %2613 = vmatprep.subr.bf16.mxu1 %v3372_v0 }
 0x938   :  { %2614 = vmatpush3.bf16.msra.mxu1 %v2817_v53 }
 0x939   :  { %2639 = vmatprep.subr.bf16.mxu1 %v3372_v0 }
 0x9ee   :  { %v1539_v47 = vpop.f32.mrb[20].mxu1 }
 0x9ef   :  { %v1546_v48 = vpack.c.bf16 %v1539_v47, %v1539_v47  ;;  %1545 = vst [vmem:[#allocation25] sm:$0xff] %v1539_v47  ;;  %v2597_v49 = vpop.f32.mrb[21].mxu1 }
 0x9f0   :  { %v1542_v50 = vpop.f32.mrb[22].mxu1 }
 0x9f1   :  { %v2598_v52 = vpop.f32.mrb[23].mxu1  ;;  %1676 = vmatmul.mubr.bf16.vlgmr.msra.gmra.mrb[24].mxu0 %v1546_v48 }
 0x9f2   :  { %2635 = vmatprep.mubr.msk.bf16.mxu0 %vm3373_vm0, %v3372_v0  ;;  %2620 = vmatpush3.bf16.msra.mxu0 %v2826_v54 }
 0x9f3   :  { %2621 = vmatprep.subr.bf16.mxu0 %v3372_v0 }
 0x9f6   :  { %2622 = vmatpush3.bf16.msra.mxu0 %v2827_v55 }
 0x9f7   :  { %2623 = vmatprep.subr.bf16.mxu0 %v3372_v0 }
 0x9fa   :  { %2624 = vmatpush3.bf16.msra.mxu0 %v2828_v56 }
 0x9fb   :  { %2625 = vmatprep.subr.bf16.mxu0 %v3372_v0 }
 0x9fe   :  { %2626 = vmatpush3.bf16.msra.mxu0 %v2829_v57 }
 0x9ff   :  { %2627 = vmatprep.subr.bf16.mxu0 %v3372_v0 }
 0xa02   :  { %2628 = vmatpush3.bf16.msra.mxu0 %v2830_v59 }
 0xa03   :  { %2629 = vmatprep.subr.bf16.mxu0 %v3372_v0 }
 0xa06   :  { %2630 = vmatpush3.bf16.msra.mxu0 %v2831_v60 }
 0xa07   :  { %2631 = vmatprep.subr.bf16.mxu0 %v3372_v0 }
 0xa0a   :  { %2632 = vmatpush3.bf16.msra.mxu0 %v2832_v17 }
 0xa0b   :  { %2633 = vmatprep.subr.bf16.mxu0 %v3372_v0 }
 0xa0e   :  { %2634 = vmatpush3.bf16.msra.mxu0 %v2833_v18 }
 0xac4   :  { %v1677_v62 = vpop.f32.mrb[24].mxu0 }
 0xac5   :  { %v1689_v63 = vadd.f32 %v2266_v61, %v1677_v62  ;;  %v1679_v1 = vpop.f32.mrb[25].mxu0 }
 0xac6   :  { %v1681_v2 = vpop.f32.mrb[26].mxu0  ;;  %v1696_v13 = vadd.f32 %v2267_v11, %v1679_v1 }
 0xac7   :  { %v1690_v3 = vmax.f32 %v1689_v63, 0.0  ;;  %v1682_v58 = vpop.f32.mrb[27].mxu0 }
 0xac8   :  { %v1697_v15 = vmax.f32 %v1696_v13, 0.0 }
 0xac9   :  { %v1698_v5 = vpack.c.bf16 %v1690_v3, %v1690_v3 }
 0xaca   :  { %v1920_v16 = vpack.c.bf16 %v1697_v15, %v1697_v15 }
 0xacb   :  { %2616 = vmatmul.mubr.bf16.vlgmr.msra.gmra.mrb[24].mxu1 %v1698_v5 }
 0xacc   :  { %2640 = vmatpush3.bf16.msra.mxu1 %v2818_v4  ;;  %2655 = vmatprep.mubr.msk.bf16.mxu1 %vm3373_vm0, %v3372_v0 }
 0xacd   :  { %2641 = vmatprep.subr.bf16.mxu1 %v3372_v0 }
 0xad0   :  { %2642 = vmatpush3.bf16.msra.mxu1 %v2819_v6 }
 0xad1   :  { %2643 = vmatprep.subr.bf16.mxu1 %v3372_v0 }
 0xad4   :  { %2644 = vmatpush3.bf16.msra.mxu1 %v2820_v7 }
 0xad5   :  { %2645 = vmatprep.subr.bf16.mxu1 %v3372_v0 }
 0xad8   :  { %2646 = vmatpush3.bf16.msra.mxu1 %v2821_v8 }
 0xad9   :  { %2647 = vmatprep.subr.bf16.mxu1 %v3372_v0 }
 0xadc   :  { %2648 = vmatpush3.bf16.msra.mxu1 %v2822_v9 }
 0xadd   :  { %2649 = vmatprep.subr.bf16.mxu1 %v3372_v0 }
 0xae0   :  { %2650 = vmatpush3.bf16.msra.mxu1 %v2823_v10 }
 0xae1   :  { %2651 = vmatprep.subr.bf16.mxu1 %v3372_v0 }
 0xae4   :  { %2652 = vmatpush3.bf16.msra.mxu1 %v2824_v12 }
 0xae5   :  { %2653 = vmatprep.subr.bf16.mxu1 %v3372_v0 }
 0xae8   :  { %2654 = vmatpush3.bf16.msra.mxu1 %v2825_v14 }
 0xaeb   :  { %2656 = vmatmul.mubr.bf16.vlgmr.msra.gmra.mrb[28].mxu1 %v1920_v16 }
 0xb9e   :  { %v1802_v20 = vpop.f32.mrb[24].mxu1 }
 0xb9f   :  { %v1803_v51 = vadd.f32 %v2268_v19, %v1802_v20  ;;  %v2617_v21 = vpop.f32.mrb[25].mxu1 }
 0xba0   :  { %v1805_v22 = vpop.f32.mrb[26].mxu1 }
 0xba1   :  { %v1808_v23 = vmax.f32 %v1803_v51, 0.0  ;;  %v2618_v24 = vpop.f32.mrb[27].mxu1 }
 0xba3   :  { %v1809_v25 = vpack.c.bf16 %v1808_v23, %v1808_v23 }
 0xba5   :  { %2636 = vmatmul.mubr.bf16.vlgmr.msra.gmra.mrb[28].mxu0 %v1809_v25 }
 0xbbe   :  { %v2024_v27 = vpop.f32.mrb[28].mxu1 }
 0xbbf   :  { %v2025_v0 = vadd.f32 %v2286_v26, %v2024_v27  ;;  %v2657_v28 = vpop.f32.mrb[29].mxu1 }
 0xbc0   :  { %v2027_v29 = vpop.f32.mrb[30].mxu1 }
 0xbc1   :  { %2030 = vst [vmem:[#allocation32] sm:$0xff] %v2025_v0  ;;  %v2658_v30 = vpop.f32.mrb[31].mxu1 }
 0xbc2   :  { %3161 = shalt.err (!%p3158_p4)
}
 0xbc3   :  { %s3162_s19 = scalar_lea.hbm %s4044_s16, 128 }
 0xbc4   :  { %p3163_p5 = scmp.ne.s32.totalorder %s4044_s16, %s3162_s19  ;;  %p3166_p6 = scmp.lt.u32.totalorder %s3162_s19, %s4044_s16 }
 0xbc6   :  { %p3168_p7 = pnand %p3166_p6, %p3163_p5 }
 0xbc8   :  { %3171 = shalt.err (!%p3168_p7)
}
 0xbc9   :  { %2050 = dma.vmem_to_hbm [thread:$0]  %s2048_s25, 128, %s4044_s16, [#allocation27]  }
 0xbca   :  { %s3172_s12 = scalar_lea.vmem %s2068_s10, 128  ;;  %p3177_p9 = scmp.lt.s32.totalorder %s2068_s10, %s2068_s10 }
 0xbcb   :  { %p3173_p8 = scmp.ne.s32.totalorder %s2068_s10, %s3172_s12  ;;  %p3178_p10 = scmp.lt.s32.totalorder %s3172_s12, %s3172_s12 }
 0xbcd   :  { %p3179_p11 = por %p3178_p10, %p3177_p9 }
 0xbcf   :  { %p3180_p12 = pnand %p3179_p11, %p3173_p8 }
 0xbd1   :  { %3183 = shalt.err (!%p3180_p12)
}
 0xbd2   :  { %s3184_s23 = scalar_lea.hbm %s4046_s18, 128 }
 0xbd3   :  { %p3185_p13 = scmp.ne.s32.totalorder %s4046_s18, %s3184_s23  ;;  %p3188_p0 = scmp.lt.u32.totalorder %s3184_s23, %s4046_s18 }
 0xbd5   :  { %p3190_p1 = pnand %p3188_p0, %p3185_p13 }
 0xbd7   :  { %3193 = shalt.err (!%p3190_p1)
}
 0xbd8   :  { %2070 = dma.vmem_to_hbm [thread:$0]  %s2068_s10, 128, %s4046_s18, [#allocation30]  }
 0xbd9   :  { %s3377_s21 = smov [#allocation32]   ;;  %s3378_s4 = smov [#allocation25]  }
 0xbda   :  { %s2087_s11 = sshll.u32 %s3377_s21, 4  ;;  %s2037_s25 = sshll.u32 %s3378_s4, 4  ;;  %s2088_s11 = int_to_ptr.vmem [resolvable:$true] %s2087_s11  ;;  %s2038_s25 = int_to_ptr.vmem [resolvable:$true] %s2037_s25 }
 0xbdb   :  { %s3194_s24 = scalar_lea.vmem %s2088_s11, 128  ;;  %p3199_p3 = scmp.lt.s32.totalorder %s2088_s11, %s2088_s11 }
 0xbdc   :  { %p3195_p2 = scmp.ne.s32.totalorder %s2088_s11, %s3194_s24  ;;  %p3200_p4 = scmp.lt.s32.totalorder %s3194_s24, %s3194_s24 }
 0xbde   :  { %p3201_p5 = por %p3200_p4, %p3199_p3 }
 0xbe0   :  { %p3202_p6 = pnand %p3201_p5, %p3195_p2 }
 0xbe2   :  { %3205 = shalt.err (!%p3202_p6)
}
 0xbe3   :  { %s3206_s27 = scalar_lea.hbm %s4048_s20, 128 }
 0xbe4   :  { %p3207_p7 = scmp.ne.s32.totalorder %s4048_s20, %s3206_s27  ;;  %p3210_p8 = scmp.lt.u32.totalorder %s3206_s27, %s4048_s20 }
 0xbe6   :  { %p3212_p9 = pnand %p3210_p8, %p3207_p7 }
 0xbe8   :  { %3215 = shalt.err (!%p3212_p9)
}
 0xbe9   :  { %2090 = dma.vmem_to_hbm [thread:$0]  %s2088_s11, 128, %s4048_s20, [#allocation33]  }
 0xbea   :  { %s3216_s9 = scalar_lea.vmem %s2038_s25, 128  ;;  %p3221_p11 = scmp.lt.s32.totalorder %s2038_s25, %s2038_s25 }
 0xbeb   :  { %p3217_p10 = scmp.ne.s32.totalorder %s2038_s25, %s3216_s9  ;;  %p3222_p12 = scmp.lt.s32.totalorder %s3216_s9, %s3216_s9 }
 0xbed   :  { %p3223_p13 = por %p3222_p12, %p3221_p11 }
 0xbef   :  { %p3224_p0 = pnand %p3223_p13, %p3217_p10 }
 0xbf1   :  { %3227 = shalt.err (!%p3224_p0)
}
 0xbf2   :  { %s3228_s12 = scalar_lea.hbm %s4043_s15, 128 }
 0xbf3   :  { %p3229_p1 = scmp.ne.s32.totalorder %s4043_s15, %s3228_s12  ;;  %p3232_p2 = scmp.lt.u32.totalorder %s3228_s12, %s4043_s15 }
 0xbf5   :  { %p3234_p3 = pnand %p3232_p2, %p3229_p1 }
 0xbf7   :  { %3237 = shalt.err (!%p3234_p3)
}
 0xbf8   :  { %2040 = dma.vmem_to_hbm [thread:$0]  %s2038_s25, 128, %s4043_s15, [#allocation4]  }
 0xbf9   :  { %s3379_s30 = smov [#allocation28]   ;;  %s3380_s16 = smov [#allocation31]  }
 0xbfa   :  { %s2057_s29 = sshll.u32 %s3379_s30, 4  ;;  %s2077_s26 = sshll.u32 %s3380_s16, 4  ;;  %s2058_s29 = int_to_ptr.vmem [resolvable:$true] %s2057_s29  ;;  %s2078_s26 = int_to_ptr.vmem [resolvable:$true] %s2077_s26 }
 0xbfb   :  { %s3238_s21 = scalar_lea.vmem %s2058_s29, 128  ;;  %p3243_p5 = scmp.lt.s32.totalorder %s2058_s29, %s2058_s29 }
 0xbfc   :  { %p3239_p4 = scmp.ne.s32.totalorder %s2058_s29, %s3238_s21  ;;  %p3244_p6 = scmp.lt.s32.totalorder %s3238_s21, %s3238_s21 }
 0xbfe   :  { %p3245_p7 = por %p3244_p6, %p3243_p5 }
 0xc00   :  { %p3246_p8 = pnand %p3245_p7, %p3239_p4 }
 0xc02   :  { %3249 = shalt.err (!%p3246_p8)
}
 0xc03   :  { %s3250_s24 = scalar_lea.hbm %s4045_s17, 128 }
 0xc04   :  { %p3251_p9 = scmp.ne.s32.totalorder %s4045_s17, %s3250_s24  ;;  %p3254_p10 = scmp.lt.u32.totalorder %s3250_s24, %s4045_s17 }
 0xc06   :  { %p3256_p11 = pnand %p3254_p10, %p3251_p9 }
 0xc08   :  { %3259 = shalt.err (!%p3256_p11)
}
 0xc09   :  { %2060 = dma.vmem_to_hbm [thread:$0]  %s2058_s29, 128, %s4045_s17, [#allocation27]  }
 0xc0a   :  { %s3260_s0 = scalar_lea.vmem %s2078_s26, 128  ;;  %p3265_p13 = scmp.lt.s32.totalorder %s2078_s26, %s2078_s26 }
 0xc0b   :  { %p3261_p12 = scmp.ne.s32.totalorder %s2078_s26, %s3260_s0  ;;  %p3266_p0 = scmp.lt.s32.totalorder %s3260_s0, %s3260_s0 }
 0xc0d   :  { %p3267_p1 = por %p3266_p0, %p3265_p13 }
 0xc0f   :  { %p3268_p2 = pnand %p3267_p1, %p3261_p12 }
 0xc11   :  { %3271 = shalt.err (!%p3268_p2)
}
 0xc12   :  { %s4084_s8 = sld [smem:[#allocation57_spill]] }
 0xc18   :  { %s3272_s6 = scalar_lea.hbm %s4084_s8, 128 }
 0xc19   :  { %p3273_p3 = scmp.ne.s32.totalorder %s4084_s8, %s3272_s6  ;;  %p3276_p4 = scmp.lt.u32.totalorder %s3272_s6, %s4084_s8 }
 0xc1b   :  { %p3278_p5 = pnand %p3276_p4, %p3273_p3 }
 0xc1d   :  { %3281 = shalt.err (!%p3278_p5)
}
 0xc1e   :  { %2080 = dma.vmem_to_hbm [thread:$0]  %s2078_s26, 128, %s4084_s8, [#allocation30]  }
 0xc1f   :  { %s3381_s13 = smov [#allocation34]  }
 0xc20   :  { %s2097_s23 = sshll.u32 %s3381_s13, 4  ;;  %s2098_s23 = int_to_ptr.vmem [resolvable:$true] %s2097_s23 }
 0xc21   :  { %s3282_s28 = scalar_lea.vmem %s2098_s23, 128  ;;  %p3287_p7 = scmp.lt.s32.totalorder %s2098_s23, %s2098_s23 }
 0xc22   :  { %p3283_p6 = scmp.ne.s32.totalorder %s2098_s23, %s3282_s28  ;;  %p3288_p8 = scmp.lt.s32.totalorder %s3282_s28, %s3282_s28 }
 0xc24   :  { %p3289_p9 = por %p3288_p8, %p3287_p7 }
 0xc26   :  { %p3290_p10 = pnand %p3289_p9, %p3283_p6 }
 0xc28   :  { %3293 = shalt.err (!%p3290_p10)
}
 0xc29   :  { %s4085_s30 = sld [smem:[#allocation58_spill]] }
 0xc2f   :  { %s3294_s29 = scalar_lea.hbm %s4085_s30, 128 }
 0xc30   :  { %p3295_p11 = scmp.ne.s32.totalorder %s4085_s30, %s3294_s29  ;;  %p3298_p12 = scmp.lt.u32.totalorder %s3294_s29, %s4085_s30 }
 0xc32   :  { %p3300_p13 = pnand %p3298_p12, %p3295_p11 }
 0xc34   :  { %3303 = shalt.err (!%p3300_p13)
}
 0xc35   :  { %2100 = dma.vmem_to_hbm [thread:$0]  %s2098_s23, 128, %s4085_s30, [#allocation33]   ;;  %v2277_v31 = vld [vmem:[%s4042_s14 + $0x10] ss:$0 sm:$0xff] }
 0xc36   :  { %s3382_s15 = smov [#allocation35]  }
 0xc37   :  { %s2107_s25 = sshll.u32 %s3382_s15, 4  ;;  %s2108_s25 = int_to_ptr.vmem [resolvable:$true] %s2107_s25 }
 0xc38   :  { %s3304_s27 = scalar_lea.vmem %s2108_s25, 128  ;;  %p3309_p1 = scmp.lt.s32.totalorder %s2108_s25, %s2108_s25 }
 0xc39   :  { %p3305_p0 = scmp.ne.s32.totalorder %s2108_s25, %s3304_s27  ;;  %p3310_p2 = scmp.lt.s32.totalorder %s3304_s27, %s3304_s27 }
 0xc3b   :  { %p3311_p3 = por %p3310_p2, %p3309_p1 }
 0xc3d   :  { %p3312_p4 = pnand %p3311_p3, %p3305_p0 }
 0xc78   :  { %v1913_v32 = vpop.f32.mrb[28].mxu0 }
 0xc79   :  { %v1914_v33 = vadd.f32 %v2277_v31, %v1913_v32  ;;  %v2637_v34 = vpop.f32.mrb[29].mxu0 }
 0xc7a   :  { %v1916_v35 = vpop.f32.mrb[30].mxu0 }
 0xc7b   :  { %1919 = vst [vmem:[#allocation35] sm:$0xff] %v1914_v33  ;;  %v2638_v36 = vpop.f32.mrb[31].mxu0 }
 0xc7c   :  { %3315 = shalt.err (!%p3312_p4)
}
 0xc7d   :  { %s4086_s18 = sld [smem:[#allocation59_spill]] }
 0xc83   :  { %s3316_s14 = scalar_lea.hbm %s4086_s18, 128 }
 0xc84   :  { %p3317_p5 = scmp.ne.s32.totalorder %s4086_s18, %s3316_s14  ;;  %p3320_p6 = scmp.lt.u32.totalorder %s3316_s14, %s4086_s18 }
 0xc86   :  { %p3322_p7 = pnand %p3320_p6, %p3317_p5 }
 0xc88   :  { %3325 = shalt.err (!%p3322_p7)
}
 0xc89   :  { %2110 = dma.vmem_to_hbm [thread:$0]  %s2108_s25, 128, %s4086_s18, [#allocation36]  }
 0xc8a   :  { %3342 = dma.done.wait [#allocation4], 128  }
 0xc8b   :  { %3343 = vsyncadd [#allocation4], 4294967168 }
 0xc8c   :  { %3344 = dma.done.wait [#allocation27], 256  }
 0xc8d   :  { %3345 = vsyncadd [#allocation27], 4294967040 }
 0xc8e   :  { %3346 = dma.done.wait [#allocation30], 256  }
 0xc8f   :  { %3347 = vsyncadd [#allocation30], 4294967040 }
 0xc90   :  { %3348 = dma.done.wait [#allocation33], 256  }
 0xc91   :  { %3349 = vsyncadd [#allocation33], 4294967040 }
 0xc92   :  { %3350 = dma.done.wait [#allocation36], 128  }
 0xc93   :  { %3351 = vsyncadd [#allocation36], 4294967168 }
 0xc94   :  { %2135 = vsyncpa [#allocation3], 1 }
 0xc95   :  { %2136 = vsyncpa [#allocation6], 1 }
 0xc96   :  { %2137 = vsyncpa [#allocation9], 1 }
 0xc97   :  { %2138 = vsyncpa [#allocation12], 1 }
 0xc98   :  { %2139 = vsyncpa [#allocation15], 1 }
 0xc99   :  { %2140 = vsyncpa [#allocation18], 1 }
 0xc9a   :  { %2141 = vsyncpa [#allocation21], 1 }
 0xc9b   :  { %2142 = vsyncpa [#allocation24], 1 }
 0xc9c   :  { %2143 = vsyncpa [#allocation4], 1 }
 0xc9d   :  { %2144 = vsyncpa [#allocation27], 1 }
 0xc9e   :  { %2145 = vsyncpa [#allocation30], 1 }
 0xc9f   :  { %2146 = vsyncpa [#allocation33], 1 }
 0xca0   :  { %2147 = vsyncpa [#allocation36], 1 }

</bundles_post_ra>
